<compile_context>
chip_gen: v5e
topology: v5e:2x2
jax: 0.10.0
libtpu: 0.0.40
codegen_flags: <defaults>
</compile_context>

<pallas_src>
import jax
import jax.numpy as jnp
from jax.experimental import pallas as pl
from jax.experimental.pallas import tpu as pltpu

MAX_TWEETS = 4            # module hardcodes 200; scaled down for the small demo
SEQ_LEN = 16
EMBED_DIM = 32
VOCAB_SIZE = 50
FILTER_SIZES = (2, 3, 4)
NUM_FILTERS = (128, 128, 128)
NUM_GROUPS = 4            # demo batch = NUM_GROUPS * MAX_TWEETS tweets
BATCH = NUM_GROUPS * MAX_TWEETS
TOTAL_FILTERS = sum(NUM_FILTERS)

KMAX = max(FILTER_SIZES)          # widest conv kernel (4 taps)
VPAD = 64                         # vocab padded so KMAX*VPAD = 256 contraction lanes
TL = MAX_TWEETS * SEQ_LEN         # 64 token rows per tweet-group

assert VPAD >= VOCAB_SIZE
assert SEQ_LEN >= KMAX, "hoisted bias+ReLU needs >=1 valid conv position per bank"


def _cnn_nlp_kernel(codes_ref, tw_ref, b_ref, mask_ref, out_ref):
    """One grid step = Gb groups of MAX_TWEETS tweets.

    codes_ref: (Gb, KMAX, TL, 1) int32  tap-coded ids: code = k*VPAD + id(token i+k)
    tw_ref:    (KMAX*VPAD, F)    bf16   embedding table folded into fused conv weights
    b_ref:     (1, 1, F)         f32    fused conv biases
    mask_ref:  (1, 1, L, F)      f32    0 at valid conv positions, -1e30 elsewhere
    out_ref:   (Gb, 1, F)        f32    group-summed pooled features
    """
    Gb = codes_ref.shape[0]
    M = Gb * TL

    codes = codes_ref[...]                                            # (Gb, KMAX, TL, 1)
    lane = jax.lax.broadcasted_iota(jnp.int32, (M, KMAX * VPAD), 1)

    # Multi-hot over the folded (tap, vocab) axis: exactly KMAX ones per row.
    # Static unroll: KMAX lane-broadcast compares + ORs, no sublane shifts.
    hot = None
    for k in range(KMAX):
        ck = codes[:, k, :, :].reshape(M, 1)                          # (M, 1), free slice
        eq = lane == ck
        hot = eq if hot is None else jnp.logical_or(hot, eq)
    multihot = hot.astype(jnp.bfloat16)                               # (M, KMAX*VPAD)

    # embedding + im2col + all three Conv1d banks in ONE MXU matmul (f32 accumulation).
    conv = jnp.dot(multihot, tw_ref[...],
                   preferred_element_type=jnp.float32)                # (M, F)
    conv = conv.reshape(Gb, MAX_TWEETS, SEQ_LEN, TOTAL_FILTERS) + mask_ref[...]

    # max-pool over time, then (hoisted) bias + ReLU, then sum over the tweet axis.
    pooled = jnp.max(conv, axis=2)                                    # (Gb, T, F)
    pooled = jnp.maximum(pooled + b_ref[...], 0.0)                    # == max_t relu(.)
    out_ref[...] = jnp.sum(pooled, axis=1, keepdims=True)             # (Gb, 1, F)


def _renorm_table(emb_table):
    # nn.Embedding(padding_idx=0, max_norm=5.0): row 0 zero, rows clipped to norm<=5.
    # TODO(synk): PyTorch's max_norm renormalizes in place only the rows touched by the
    # current batch; this functional variant renorms every row on every call.
    norms = jnp.linalg.norm(emb_table, axis=1, keepdims=True)
    table = emb_table * jnp.minimum(1.0, 5.0 / jnp.maximum(norms, 1e-7))
    return table.at[0].set(0.0)


def _pack_params(emb_table, conv_ws, conv_bs):
    """Host packing: table folded into zero-padded fused conv weights (bf16), bias, mask."""
    table = _renorm_table(emb_table)                                  # (V, E) f32

    tw = jnp.zeros((KMAX * VPAD, TOTAL_FILTERS), jnp.float32)
    off = 0
    for w in conv_ws:                                                 # (K, E, O)
        K, _, O = w.shape
        folded = jnp.einsum("ve,keo->kvo", table, w)                  # (K, V, O) f32
        for k in range(K):
            tw = tw.at[k * VPAD:k * VPAD + VOCAB_SIZE, off:off + O].set(folded[k])
        off += O
    tw = tw.astype(jnp.bfloat16)                                      # (KMAX*VPAD, F)

    b_fused = jnp.concatenate(conv_bs, axis=1).reshape(1, 1, TOTAL_FILTERS)
    b_fused = b_fused.astype(jnp.float32)

    # Additive mask: conv position i is valid for a bank iff i < L - K_b + 1 (its
    # receptive field stays inside the tweet).  Large finite negative, not -inf.
    pos = jnp.arange(SEQ_LEN)[None, None, :, None]                    # (1,1,L,1)
    vlen = jnp.concatenate(
        [jnp.full((1, 1, 1, nf), SEQ_LEN - fs + 1, jnp.int32)
         for fs, nf in zip(FILTER_SIZES, NUM_FILTERS)], axis=3)       # (1,1,1,F)
    mask = jnp.where(pos < vlen, 0.0, -1e30).astype(jnp.float32)      # (1,1,L,F)
    return tw, b_fused, mask


def _pack_ids(input_ids, G):
    """(B, L) token ids -> (G, KMAX, TL, 1) tap-coded ids for the folded multi-hot."""
    flat = input_ids.reshape(G, TL).astype(jnp.int32)
    flat = jnp.pad(flat, ((0, 0), (0, KMAX - 1)))   # pad with id 0 -> zero folded rows
    codes = jnp.stack([flat[:, k:k + TL] + k * VPAD for k in range(KMAX)], axis=1)
    return codes[..., None]                                           # (G, KMAX, TL, 1)


def cnn_nlp_forward(input_ids, emb_table, conv_ws, conv_bs):
    B, L = input_ids.shape
    assert L == SEQ_LEN and B % MAX_TWEETS == 0
    G = B // MAX_TWEETS

    # Groups per grid step: fill MXU rows (M = Gb*TL = 128, multiple of 128 for v5e)
    # while keeping >= 2 grid steps so both v7x TensorCores get work.  At production
    # max_tweets=200 (TL=3200) leave Gb=1.
    Gb = 2 if (G % 2 == 0 and G // 2 >= 2) else 1

    tw, b_fused, mask = _pack_params(emb_table, conv_ws, conv_bs)
    codes = _pack_ids(input_ids, G)

    out = pl.pallas_call(
        _cnn_nlp_kernel,
        out_shape=jax.ShapeDtypeStruct((G, 1, TOTAL_FILTERS), jnp.float32),
        grid_spec=pltpu.PrefetchScalarGridSpec(
            num_scalar_prefetch=0,
            grid=(G // Gb,),
            in_specs=[
                pl.BlockSpec((Gb, KMAX, TL, 1), lambda g: (g, 0, 0, 0)),
                # Grid-invariant operands: single-buffered (a second buffer buys no
                # overlap for blocks that never change and doubles their VMEM).
                pl.BlockSpec(tw.shape, lambda g: (0, 0),
                             pipeline_mode=pl.Buffered(1)),
                pl.BlockSpec(b_fused.shape, lambda g: (0, 0, 0),
                             pipeline_mode=pl.Buffered(1)),
                pl.BlockSpec(mask.shape, lambda g: (0, 0, 0, 0),
                             pipeline_mode=pl.Buffered(1)),
            ],
            out_specs=pl.BlockSpec((Gb, 1, TOTAL_FILTERS), lambda g: (g, 0, 0)),
        ),
        compiler_params=pltpu.CompilerParams(
            dimension_semantics=("parallel",),
            # Tiny at demo sizes; set explicitly, and re-derive against 64 MiB when
            # scaling up (v7x has half the VMEM of v5e/v6e).
            vmem_limit_bytes=32 * 1024 * 1024,
        ),
    )(codes, tw, b_fused, mask)
    return out.reshape(G, TOTAL_FILTERS)


def cnn_nlp_reference_folded(input_ids, emb_table, conv_ws, conv_bs):
    """Pure-JAX reference using identically folded + bf16-quantized weights (gather-based,
    per-bank, no masking trick) — isolates kernel structure from quantization error."""
    table = _renorm_table(emb_table)
    B, L = input_ids.shape
    pools = []
    for w, b in zip(conv_ws, conv_bs):                                # (K,E,O), (1,O)
        K, _, O = w.shape
        folded = jnp.einsum("ve,keo->kvo", table, w)
        folded = folded.astype(jnp.bfloat16).astype(jnp.float32)      # match kernel quant
        L_out = L - K + 1
        conv = jnp.zeros((B, L_out, O), jnp.float32)
        for k in range(K):
            conv = conv + folded[k][input_ids[:, k:k + L_out]]
        conv = conv + b[None]
        pools.append(jnp.max(jax.nn.relu(conv), axis=1))              # (B, O)
    x_fc = jnp.concatenate(pools, axis=1)                             # (B, F)
    return jnp.sum(x_fc.reshape(B // MAX_TWEETS, MAX_TWEETS, -1), axis=1)


def cnn_nlp_reference_f32(input_ids, emb_table, conv_ws, conv_bs):
    """Plain f32 reference of the original module math (no quantization, no folding)."""
    table = _renorm_table(emb_table)
    x = table[input_ids]                                              # (B, L, E)
    B, L, _ = x.shape
    pools = []
    for w, b in zip(conv_ws, conv_bs):
        K, _, O = w.shape
        L_out = L - K + 1
        conv = jnp.zeros((B, L_out, O), jnp.float32)
        for k in range(K):
            conv += jnp.einsum("ble,eo->blo", x[:, k:k + L_out, :], w[k])
        conv = conv + b[None]
        pools.append(jnp.max(jax.nn.relu(conv), axis=1))
    x_fc = jnp.concatenate(pools, axis=1)
    return jnp.sum(x_fc.reshape(B // MAX_TWEETS, MAX_TWEETS, -1), axis=1)


def init_params(key):
    keys = jax.random.split(key, 1 + 2 * len(FILTER_SIZES))
    emb_table = jax.random.normal(keys[0], (VOCAB_SIZE, EMBED_DIM), jnp.float32) * 0.5
    conv_ws, conv_bs = [], []
    for i, (fs, nf) in enumerate(zip(FILTER_SIZES, NUM_FILTERS)):
        wk, bk = keys[1 + 2 * i], keys[2 + 2 * i]
        bound = 1.0 / jnp.sqrt(EMBED_DIM * fs)
        conv_ws.append(jax.random.uniform(wk, (fs, EMBED_DIM, nf), jnp.float32,
                                          -bound, bound))
        conv_bs.append(jax.random.uniform(bk, (1, nf), jnp.float32, -bound, bound))
    return emb_table, conv_ws, conv_bs


if __name__ == "__main__":
    key = jax.random.PRNGKey(0)
    k_ids, k_params = jax.random.split(key)
    input_ids = jax.random.randint(k_ids, (BATCH, SEQ_LEN), 0, VOCAB_SIZE,
                                   dtype=jnp.int32)
    emb_table, conv_ws, conv_bs = init_params(k_params)

    out = jax.block_until_ready(
        cnn_nlp_forward(input_ids, emb_table, conv_ws, conv_bs))
    assert out.shape == (NUM_GROUPS, TOTAL_FILTERS), out.shape

    # Tight check vs. identically-quantized folded reference (kernel structure),
    # loose check vs. plain f32 module math (quantization bounded).
    ref_q = jax.block_until_ready(
        cnn_nlp_reference_folded(input_ids, emb_table, conv_ws, conv_bs))
    ref_f = jax.block_until_ready(
        cnn_nlp_reference_f32(input_ids, emb_table, conv_ws, conv_bs))
    assert jnp.allclose(out, ref_q, rtol=1e-3, atol=1e-3), (
        float(jnp.max(jnp.abs(out - ref_q))))
    assert jnp.allclose(out, ref_f, rtol=1e-1, atol=1e-1), (
        float(jnp.max(jnp.abs(out - ref_f))))
    print("KERNEL_OK")
</pallas_src>

<mosaic_0001>
module attributes {stable_mosaic.version = 11 : i64} {
  func.func @_cnn_nlp_kernel(%arg0: i32, %arg1: memref<2x4x64x1xi32, #tpu.memory_space<vmem>>, %arg2: memref<256x384xbf16, #tpu.memory_space<vmem>>, %arg3: memref<1x1x384xf32, #tpu.memory_space<vmem>>, %arg4: memref<1x1x16x384xf32, #tpu.memory_space<vmem>>, %arg5: memref<2x1x384xf32, #tpu.memory_space<vmem>>) attributes {dimension_semantics = [#tpu.dimension_semantics<parallel>], iteration_bounds = array<i64: 2>, scalar_prefetch = 0 : i64, scratch_operands = 0 : i64, tpu.core_type = #tpu.core_type<tc>, window_params = [{transform_indices = @transform_0, window_bounds = array<i64: 2, 4, 64, 1>}, {pipeline_mode = #tpu.pipeline_mode<synchronous>, transform_indices = @transform_1, window_bounds = array<i64: 256, 384>}, {pipeline_mode = #tpu.pipeline_mode<synchronous>, transform_indices = @transform_2, window_bounds = array<i64: 1, 1, 384>}, {pipeline_mode = #tpu.pipeline_mode<synchronous>, transform_indices = @transform_3, window_bounds = array<i64: 1, 1, 16, 384>}, {transform_indices = @transform_4, window_bounds = array<i64: 2, 1, 384>}]} {
    %c0 = arith.constant 0 : index
    %c0_0 = arith.constant 0 : index
    %c0_1 = arith.constant 0 : index
    %c0_2 = arith.constant 0 : index
    %0 = vector.load %arg1[%c0, %c0_0, %c0_1, %c0_2] : memref<2x4x64x1xi32, #tpu.memory_space<vmem>>, vector<2x4x64x1xi32>
    %1 = tpu.iota {dimensions = array<i32: 1>} : vector<128x256xi32>
    %2 = vector.extract_strided_slice %0 {offsets = [0, 0, 0, 0], sizes = [2, 1, 64, 1], strides = [1, 1, 1, 1]} : vector<2x4x64x1xi32> to vector<2x1x64x1xi32>
    %3 = vector.shape_cast %2 : vector<2x1x64x1xi32> to vector<2x64x1xi32>
    %4 = vector.shape_cast %3 : vector<2x64x1xi32> to vector<128x1xi32>
    %5 = vector.broadcast %4 : vector<128x1xi32> to vector<128x256xi32>
    %6 = arith.cmpi eq, %1, %5 : vector<128x256xi32>
    %7 = vector.extract_strided_slice %0 {offsets = [0, 1, 0, 0], sizes = [2, 1, 64, 1], strides = [1, 1, 1, 1]} : vector<2x4x64x1xi32> to vector<2x1x64x1xi32>
    %8 = vector.shape_cast %7 : vector<2x1x64x1xi32> to vector<2x64x1xi32>
    %9 = vector.shape_cast %8 : vector<2x64x1xi32> to vector<128x1xi32>
    %10 = vector.broadcast %9 : vector<128x1xi32> to vector<128x256xi32>
    %11 = arith.cmpi eq, %1, %10 : vector<128x256xi32>
    %12 = arith.ori %6, %11 : vector<128x256xi1>
    %13 = vector.extract_strided_slice %0 {offsets = [0, 2, 0, 0], sizes = [2, 1, 64, 1], strides = [1, 1, 1, 1]} : vector<2x4x64x1xi32> to vector<2x1x64x1xi32>
    %14 = vector.shape_cast %13 : vector<2x1x64x1xi32> to vector<2x64x1xi32>
    %15 = vector.shape_cast %14 : vector<2x64x1xi32> to vector<128x1xi32>
    %16 = vector.broadcast %15 : vector<128x1xi32> to vector<128x256xi32>
    %17 = arith.cmpi eq, %1, %16 : vector<128x256xi32>
    %18 = arith.ori %12, %17 : vector<128x256xi1>
    %19 = vector.extract_strided_slice %0 {offsets = [0, 3, 0, 0], sizes = [2, 1, 64, 1], strides = [1, 1, 1, 1]} : vector<2x4x64x1xi32> to vector<2x1x64x1xi32>
    %20 = vector.shape_cast %19 : vector<2x1x64x1xi32> to vector<2x64x1xi32>
    %21 = vector.shape_cast %20 : vector<2x64x1xi32> to vector<128x1xi32>
    %22 = vector.broadcast %21 : vector<128x1xi32> to vector<128x256xi32>
    %23 = arith.cmpi eq, %1, %22 : vector<128x256xi32>
    %24 = arith.ori %18, %23 : vector<128x256xi1>
    %25 = arith.extui %24 : vector<128x256xi1> to vector<128x256xi32>
    %26 = arith.sitofp %25 : vector<128x256xi32> to vector<128x256xf32>
    %27 = arith.truncf %26 : vector<128x256xf32> to vector<128x256xbf16>
    %c0_3 = arith.constant 0 : index
    %c0_4 = arith.constant 0 : index
    %28 = vector.load %arg2[%c0_3, %c0_4] : memref<256x384xbf16, #tpu.memory_space<vmem>>, vector<256x384xbf16>
    %cst = arith.constant dense<0.000000e+00> : vector<128x384xf32>
    %29 = tpu.matmul %27, %28, %cst {dimension_numbers = #tpu.dot_dimension_numbers<[1], [0], [0], [1], [0, 0, 1, 1], [], []>} : vector<128x256xbf16>, vector<256x384xbf16>, vector<128x384xf32> -> vector<128x384xf32>
    %30 = vector.shape_cast %29 : vector<128x384xf32> to vector<2x4x16x384xf32>
    %c0_5 = arith.constant 0 : index
    %c0_6 = arith.constant 0 : index
    %c0_7 = arith.constant 0 : index
    %c0_8 = arith.constant 0 : index
    %31 = vector.load %arg4[%c0_5, %c0_6, %c0_7, %c0_8] : memref<1x1x16x384xf32, #tpu.memory_space<vmem>>, vector<1x1x16x384xf32>
    %32 = vector.broadcast %31 : vector<1x1x16x384xf32> to vector<2x4x16x384xf32>
    %33 = arith.addf %30, %32 : vector<2x4x16x384xf32>
    %cst_9 = arith.constant dense<0xFF800000> : vector<2x4x384xf32>
    %34 = vector.multi_reduction <maximumf>, %33, %cst_9 [2] : vector<2x4x16x384xf32> to vector<2x4x384xf32>
    %c0_10 = arith.constant 0 : index
    %c0_11 = arith.constant 0 : index
    %c0_12 = arith.constant 0 : index
    %35 = vector.load %arg3[%c0_10, %c0_11, %c0_12] : memref<1x1x384xf32, #tpu.memory_space<vmem>>, vector<1x1x384xf32>
    %36 = vector.broadcast %35 : vector<1x1x384xf32> to vector<2x4x384xf32>
    %37 = arith.addf %34, %36 : vector<2x4x384xf32>
    %cst_13 = arith.constant 0.000000e+00 : f32
    %38 = vector.broadcast %cst_13 : f32 to vector<2x4x384xf32>
    %39 = arith.maximumf %37, %38 : vector<2x4x384xf32>
    %cst_14 = arith.constant dense<0.000000e+00> : vector<2x384xf32>
    %40 = vector.multi_reduction <add>, %39, %cst_14 [1] : vector<2x4x384xf32> to vector<2x384xf32>
    %41 = vector.shape_cast %40 : vector<2x384xf32> to vector<2x1x384xf32>
    %c0_15 = arith.constant 0 : index
    %c0_16 = arith.constant 0 : index
    %c0_17 = arith.constant 0 : index
    %42 = vector.load %arg5[%c0_15, %c0_16, %c0_17] : memref<2x1x384xf32, #tpu.memory_space<vmem>>, vector<2x1x384xf32>
    tpu.vector_store %arg5[%c0_15, %c0_16, %c0_17], %41 {strides = array<i32>} : memref<2x1x384xf32, #tpu.memory_space<vmem>>, vector<2x1x384xf32>,
    return
  }
  func.func @transform_0(%arg0: i32) -> (i32, i32, i32, i32) {
    %c0_i32 = arith.constant 0 : i32
    %c0_i32_0 = arith.constant 0 : i32
    %c0_i32_1 = arith.constant 0 : i32
    %c0_i32_2 = arith.constant 0 : i32
    return %arg0, %c0_i32, %c0_i32_0, %c0_i32_1 : i32, i32, i32, i32
  }
  func.func @transform_1(%arg0: i32) -> (i32, i32) {
    %c0_i32 = arith.constant 0 : i32
    %c0_i32_0 = arith.constant 0 : i32
    %c0_i32_1 = arith.constant 0 : i32
    return %c0_i32, %c0_i32_0 : i32, i32
  }
  func.func @transform_2(%arg0: i32) -> (i32, i32, i32) {
    %c0_i32 = arith.constant 0 : i32
    %c0_i32_0 = arith.constant 0 : i32
    %c0_i32_1 = arith.constant 0 : i32
    %c0_i32_2 = arith.constant 0 : i32
    return %c0_i32, %c0_i32_0, %c0_i32_1 : i32, i32, i32
  }
  func.func @transform_3(%arg0: i32) -> (i32, i32, i32, i32) {
    %c0_i32 = arith.constant 0 : i32
    %c0_i32_0 = arith.constant 0 : i32
    %c0_i32_1 = arith.constant 0 : i32
    %c0_i32_2 = arith.constant 0 : i32
    %c0_i32_3 = arith.constant 0 : i32
    return %c0_i32, %c0_i32_0, %c0_i32_1, %c0_i32_2 : i32, i32, i32, i32
  }
  func.func @transform_4(%arg0: i32) -> (i32, i32, i32) {
    %c0_i32 = arith.constant 0 : i32
    %c0_i32_0 = arith.constant 0 : i32
    %c0_i32_1 = arith.constant 0 : i32
    return %arg0, %c0_i32, %c0_i32_0 : i32, i32, i32
  }
}

</mosaic_0001>

<bundles_post_ra>
// kernel: tpu_custom_call.1
= control target key start
LH: loop header
LB: loop body
LE: loop exit
PB: predicated region body
PF: predicated region fallthrough
CT: control target
= control target key end

     0   :  { %9 = vsyncpa [#allocation3], 0  ;;  %s3614_s0 = inlined_call_operand.vmem [shape: s32[4,4,64,1], index: 0, kind: input, shape index: {}]   ;;  %s3615_s1 = inlined_call_operand.vmem [shape: bf16[256,384], index: 1, kind: input, shape index: {}]   ;;  %s3616_s2 = inlined_call_operand.vmem [shape: f32[1,1,384], index: 2, kind: input, shape index: {}]   ;;  %s3617_s3 = inlined_call_operand.vmem [shape: f32[1,1,16,384], index: 3, kind: input, shape index: {}]   ;;  %s3618_s4 = inlined_call_operand.hbm [shape: f32[4,1,384], index: 4, kind: output, shape index: {}]  }
   0x1   :  { %11 = vsyncpa [#allocation3 + $0x1], 0  ;;  %s2408_s15 = smov 0   ;;  %s2410_s16 = smov 0  }
   0x2   :  { %s2412_s17 = smov 0   ;;  %s2414_s18 = smov 0  }
   0x3 LB: > { %s2429_s19 = sadd.s32 4294967295, %s2377_s18   ;;  %s1871_s20 = sadd.s32 4294967294, %s2377_s18   ;;  %s2377_s18 = sphi %s2414_s18, %s3760_s18   ;;  %s2373_s17 = sphi %s2412_s17, %s3759_s17   ;;  %s2369_s16 = sphi %s2410_s16, %s3758_s16   ;;  %s2365_s15 = sphi %s2408_s15, %s3757_s15  }
   0x4   : > { %s2433_s21 = sadd.s32 1, %s2377_s18   ;;  %s113_s22 = sadd.s32 1, %s2373_s17 }
   0x5   : > { %s110_s23 = ssub.s32 %s2377_s18, %s2433_s21  ;;  %p123_p0 = scmp.ne.s32.totalorder %s2373_s17, %s2369_s16 }
   0x6   : > { %p111_p1 = scmp.eq.s32.totalorder %s110_s23, 0  ;;  %p124_p2 = scmp.eq.s32.totalorder %s2429_s19, 1 }
   0x7   : > { %p129_p3 = scmp.ne.s32.totalorder %s2369_s16, %s2365_s15  ;;  %p130_p4 = scmp.eq.s32.totalorder %s1871_s20, 1 }
   0x8   : > { %s2444_s24 = scalar_select %p111_p1, %s2373_s17, %s113_s22  }
   0x9   : > { %p2446_p5 = por %p124_p2, %p123_p0  ;;  %p2450_p6 = por %p130_p4, %p129_p3 }
   0xa   : > { %p1874_p7 = scmp.ge.s32.totalorder %s2377_s18, 1  ;;  %p167_p8 = scmp.lt.s32.totalorder %s2377_s18, 3 }
   0xc   : > { %p168_p9 = pnand %p1874_p7, %p167_p8 }
   0xd   : > { %s1875_s27 = sshll.u32 (!%p168_p9), %s2429_s19, 1  ;;  %s191_s11 = sand.u32 (!%p168_p9), 1, %s2369_s16  }
   0xe   : > { %171 = sbr.rel (%p168_p9) target bundleno = 620 (0x26c), region = 36  ;;  %p195_p10 = scmp.lt.s32.totalorder (!%p168_p9), %s1875_s27, 3 }
   0xf   : > { %s2267_s12 = smul.u32 (!%p168_p9), 6, %s191_s11  ;;  %s2335_s7 = scalar_lea.hbm (!%p168_p9), %s3618_s4, 12 }
  0x10   : > { %s2268_s14 = smul.u32 (!%p168_p9), 6, %s2429_s19  ;;  %s1794_s19 = scalar_lea.sflag (!%p168_p9), [#allocation3], %s191_s11 }
  0x11   : > { %s3538_s13 = scalar_lea.vmem (!%p168_p9), [#allocation2], %s2267_s12 }
  0x12   : > { %s1805_s23 = scalar_lea.hbm (!%p168_p9), %s3618_s4, %s2268_s14 }
  0x13   : > { %v2379_v0 = vmov 0   ;;  %s3762_s27 = smov (!%p195_p10, %s1875_s27), 3  ;;  %v1996_v28 = vld [vmem:[%s3615_s1 + $0xa8] sm:$0xf]  ;;  %v2225_v29 = vld [vmem:[%s3615_s1 + $0xb0] sm:$0xf0] }
  0x14   : > { %2314 = vset.pattern.permute.xlu2 %v2379_v0  ;;  %2313 = vset.pattern.permute.xlu1 %v2379_v0  ;;  %s2202_s28 = sshll.u32 %s3762_s27, 8  ;;  %v2092_v30 = vld [vmem:[%s3615_s1 + $0x168] sm:$0xf]  ;;  %v1997_v31 = vor.u32 %v2225_v29, %v1996_v28  ;;  %v2249_v32 = vld [vmem:[%s3615_s1 + $0x170] sm:$0xf0]  ;;  %s1806_s27 = sshll.u32 %s3538_s13, 4  ;;  %s1807_s27 = int_to_ptr.vmem [resolvable:$true] %s1806_s27 }
  0x15   : > { %2312 = vset.pattern.permute.xlu0 %v2379_v0  ;;  %s2460_s5 = scalar_lea.vmem %s3614_s0, %s2202_s28  ;;  %v2093_v35 = vor.u32 %v2249_v32, %v2092_v30  ;;  %v1984_v37 = vld [vmem:[%s3615_s1 + $0x90] sm:$0xf]  ;;  %v2222_v38 = vld [vmem:[%s3615_s1 + $0x98] sm:$0xf0]  ;;  %v1972_v43 = vld [vmem:[%s3615_s1 + $0x78] sm:$0xf]  ;;  %v266_v32 = vlaneseq }
  0x16   : > { %v250_v1 = vld [vmem:[%s2460_s5 + $0x180] sm:$0xff]  ;;  %v251_v4 = vld [vmem:[%s2460_s5 + $0x188] sm:$0xff]  ;;  %v236_v16 = vld [vmem:[%s2460_s5 + $0x110] sm:$0xff]  ;;  %2251 = vmatpush.bf16.msra.mxu2 %v1997_v31  ;;  %1085 = vmatpush.bf16.msra.mxu0 %v1997_v31  ;;  %v1985_v40 = vor.u32 %v2222_v38, %v1984_v37  ;;  %s1808_s28 = sshll.u32 %s1805_s23, 4  ;;  %s1809_s28 = int_to_ptr.hbm [resolvable:$true] %s1808_s28 }
  0x17   : > { %v242_v2 = vld [vmem:[%s2460_s5 + $0x140] sm:$0xff]  ;;  %486 = vperm.xlu2 %2314, %v250_v1   ;;  %v243_v5 = vld [vmem:[%s2460_s5 + $0x148] sm:$0xff]  ;;  %v237_v17 = vld [vmem:[%s2460_s5 + $0x118] sm:$0xff]  ;;  %2259 = vmatpush.bf16.msra.mxu3 %v2093_v35  ;;  %s2329_s29 = sshra.s32 %s1809_s28, 4  ;;  %s2330_s29 = int_to_ptr.hbm [resolvable:$true] %s2329_s29 }
  0x18   : > { %v234_v3 = vld [vmem:[%s2460_s5 + $0x100] sm:$0xff]  ;;  %374 = vperm.xlu1 %2313, %v242_v2   ;;  %v235_v6 = vld [vmem:[%s2460_s5 + $0x108] sm:$0xff]  ;;  %v245_v19 = vld [vmem:[%s2460_s5 + $0x158] sm:$0xff]  ;;  %1134 = vmatpush.bf16.msra.mxu1 %v2093_v35  ;;  %s2331_s30 = scalar_lea.hbm %s2330_s29, 6  ;;  %p2336_p0 = scmp.lt.s32.totalorder %s2330_s29, %s3618_s4 }
  0x19   : > { %294 = vperm.xlu0 %2312, %v234_v3   ;;  %v259_v7 = vld [vmem:[%s2460_s5 + $0x1c8] sm:$0xff]  ;;  %v202_v8 = vld [vmem:[%s2460_s5] sm:$0xff]  ;;  %v252_v20 = vld [vmem:[%s2460_s5 + $0x190] sm:$0xff]  ;;  %p2332_p11 = scmp.ne.s32.totalorder %s2330_s29, %s2331_s30  ;;  %p2337_p1 = scmp.lt.s32.totalorder %s2335_s7, %s2331_s30 }
  0x1a   : > { %v258_v9 = vld [vmem:[%s2460_s5 + $0x1c0] sm:$0xff]  ;;  %v211_v11 = vld [vmem:[%s2460_s5 + $0x48] sm:$0xff]  ;;  %v244_v21 = vld [vmem:[%s2460_s5 + $0x150] sm:$0xff]  ;;  %2252 = vmatpush.bf16.msra.mxu2 %v1985_v40  ;;  %1086 = vmatpush.bf16.msra.mxu0 %v1985_v40 }
  0x1b   : > { %v210_v10 = vld [vmem:[%s2460_s5 + $0x40] sm:$0xff]  ;;  %v203_v12 = vld [vmem:[%s2460_s5 + $0x8] sm:$0xff]  ;;  %v260_v22 = vld [vmem:[%s2460_s5 + $0x1d0] sm:$0xff]  ;;  %p2333_p12 = pnand %p2332_p11, %p2446_p5  ;;  %p2338_p2 = por %p2337_p1, %p2336_p0 }
  0x1c   : > { %v219_v13 = vld [vmem:[%s2460_s5 + $0x88] sm:$0xff]  ;;  %v226_v14 = vld [vmem:[%s2460_s5 + $0xc0] sm:$0xff]  ;;  %v261_v23 = vld [vmem:[%s2460_s5 + $0x1d8] sm:$0xff] }
  0x1d   : > { %v218_v15 = vld [vmem:[%s2460_s5 + $0x80] sm:$0xff]  ;;  %v227_v18 = vld [vmem:[%s2460_s5 + $0xc8] sm:$0xff]  ;;  %v253_v24 = vld [vmem:[%s2460_s5 + $0x198] sm:$0xff]  ;;  %p2334_p13 = pneg %p2333_p12 }
  0x1e   : > { %v205_v25 = vld [vmem:[%s2460_s5 + $0x18] sm:$0xff]  ;;  %v212_v26 = vld [vmem:[%s2460_s5 + $0x50] sm:$0xff]  ;;  %v2219_v44 = vld [vmem:[%s3615_s1 + $0x80] sm:$0xf0] }
  0x1f   : > { %489 = vperm.xlu2 %2314, %v251_v4   ;;  %v204_v27 = vld [vmem:[%s2460_s5 + $0x10] sm:$0xff]  ;;  %v221_v34 = vld [vmem:[%s2460_s5 + $0x98] sm:$0xff]  ;;  %v2243_v46 = vld [vmem:[%s3615_s1 + $0x140] sm:$0xf0]  ;;  %v1973_v49 = vor.u32 %v2219_v44, %v1972_v43  ;;  %p2339_p3 = pnand %p2338_p2, %p2334_p13 }
  0x20   : > { %377 = vperm.xlu1 %2313, %v243_v5   ;;  %v220_v33 = vld [vmem:[%s2460_s5 + $0x90] sm:$0xff]  ;;  %v213_v36 = vld [vmem:[%s2460_s5 + $0x58] sm:$0xff]  ;;  %v238_v48 = vld [vmem:[%s2460_s5 + $0x120] sm:$0xff] }
  0x21   : > { %297 = vperm.xlu0 %2312, %v235_v6   ;;  %v2080_v39 = vld [vmem:[%s3615_s1 + $0x150] sm:$0xf]  ;;  %v2246_v41 = vld [vmem:[%s3615_s1 + $0x158] sm:$0xf0]  ;;  %v2068_v45 = vld [vmem:[%s3615_s1 + $0x138] sm:$0xf]  ;;  %2253 = vmatpush.bf16.msra.mxu2 %v1973_v49 }
  0x22   : > { %v2081_v42 = vor.u32 %v2246_v41, %v2080_v39  ;;  %v229_v47 = vld [vmem:[%s2460_s5 + $0xd8] sm:$0xff]  ;;  %v228_v50 = vld [vmem:[%s2460_s5 + $0xd0] sm:$0xff]  ;;  %v2069_v51 = vor.u32 %v2243_v46, %v2068_v45  ;;  %v1960_v52 = vld [vmem:[%s3615_s1 + $0x60] sm:$0xf]  ;;  %1087 = vmatpush.bf16.msra.mxu0 %v1973_v49 }
  0x23   : > { %v2216_v53 = vld [vmem:[%s3615_s1 + $0x68] sm:$0xf0]  ;;  %v2056_v54 = vld [vmem:[%s3615_s1 + $0x120] sm:$0xf]  ;;  %v1948_v61 = vld [vmem:[%s3615_s1 + $0x48] sm:$0xf] }
  0x24   : > { %2260 = vmatpush.bf16.msra.mxu3 %v2081_v42  ;;  %1135 = vmatpush.bf16.msra.mxu1 %v2081_v42  ;;  %v1961_v55 = vor.u32 %v2216_v53, %v1960_v52  ;;  %v2240_v56 = vld [vmem:[%s3615_s1 + $0x128] sm:$0xf0]  ;;  %v246_v58 = vld [vmem:[%s2460_s5 + $0x160] sm:$0xff]  ;;  %v2213_v62 = vld [vmem:[%s3615_s1 + $0x50] sm:$0xf0] }
  0x25   : > { %v2057_v57 = vor.u32 %v2240_v56, %v2056_v54  ;;  %v239_v59 = vld [vmem:[%s2460_s5 + $0x128] sm:$0xff]  ;;  %v1949_v0 = vor.u32 %v2213_v62, %v1948_v61  ;;  %v2237_v1 = vld [vmem:[%s3615_s1 + $0x110] sm:$0xf0]  ;;  %v1936_v4 = vld [vmem:[%s3615_s1 + $0x30] sm:$0xf]  ;;  %v3655_v56 = vmov 0 }
  0x26   : > { %v247_v60 = vld [vmem:[%s2460_s5 + $0x168] sm:$0xff]  ;;  %2254 = vmatpush.bf16.msra.mxu2 %v1961_v55  ;;  %1088 = vmatpush.bf16.msra.mxu0 %v1961_v55  ;;  %v2210_v5 = vld [vmem:[%s3615_s1 + $0x38] sm:$0xf0]  ;;  %v2032_v6 = vld [vmem:[%s3615_s1 + $0xf0] sm:$0xf] }
  0x27   : > { %270 = vperm.xlu2 %2314, %v202_v8   ;;  %v2044_v63 = vld [vmem:[%s3615_s1 + $0x108] sm:$0xf]  ;;  %v2234_v8 = vld [vmem:[%s3615_s1 + $0xf8] sm:$0xf0]  ;;  %v222_v31 = vld [vmem:[%s2460_s5 + $0xa0] sm:$0xff] }
  0x28   : > { %601 = vperm.xlu1 %2313, %v259_v7   ;;  %2261 = vmatpush.bf16.msra.mxu3 %v2069_v51  ;;  %v2045_v2 = vor.u32 %v2237_v1, %v2044_v63  ;;  %v1937_v7 = vor.u32 %v2210_v5, %v1936_v4  ;;  %v263_v28 = vld [vmem:[%s2460_s5 + $0x1e8] sm:$0xff]  ;;  %v230_v38 = vld [vmem:[%s2460_s5 + $0xe0] sm:$0xff]  ;;  %v241_v46 = vld [vmem:[%s2460_s5 + $0x138] sm:$0xff] }
  0x29   : > { %598 = vperm.xlu0 %2312, %v258_v9   ;;  %1136 = vmatpush.bf16.msra.mxu1 %v2069_v51  ;;  %v2033_v9 = vor.u32 %v2234_v8, %v2032_v6  ;;  %v215_v30 = vld [vmem:[%s2460_s5 + $0x68] sm:$0xff]  ;;  %v256_v54 = vld [vmem:[%s2460_s5 + $0x1b0] sm:$0xff]  ;;  %v257_v55 = vld [vmem:[%s2460_s5 + $0x1b8] sm:$0xff] }
  0x2a   : > { %2255 = vmatpush.bf16.msra.mxu2 %v1949_v0  ;;  %1089 = vmatpush.bf16.msra.mxu0 %v1949_v0  ;;  %v231_v39 = vld [vmem:[%s2460_s5 + $0xe8] sm:$0xff]  ;;  %v265_v63 = vld [vmem:[%s2460_s5 + $0x1f8] sm:$0xff]  ;;  %v208_v0 = vld [vmem:[%s2460_s5 + $0x30] sm:$0xff] }
  0x2b   : > { %v223_v41 = vld [vmem:[%s2460_s5 + $0xa8] sm:$0xff]  ;;  %v264_v1 = vld [vmem:[%s2460_s5 + $0x1f0] sm:$0xff]  ;;  %v217_v8 = vld [vmem:[%s2460_s5 + $0x78] sm:$0xff] }
  0x2c   : > { %2262 = vmatpush.bf16.msra.mxu3 %v2057_v57  ;;  %v2224_v45 = vld [vmem:[%s3615_s1 + $0xac] sm:$0xf]  ;;  %v2094_v49 = vld [vmem:[%s3615_s1 + $0x174] sm:$0xf0]  ;;  %v1986_v5 = vld [vmem:[%s3615_s1 + $0x9c] sm:$0xf0] }
  0x2d   : > { %1137 = vmatpush.bf16.msra.mxu1 %v2057_v57  ;;  %v249_v57 = vld [vmem:[%s2460_s5 + $0x178] sm:$0xff] }
  0x2e   : > { %2256 = vmatpush.bf16.msra.mxu2 %v1937_v7  ;;  %1090 = vmatpush.bf16.msra.mxu0 %v1937_v7  ;;  %v216_v7 = vld [vmem:[%s2460_s5 + $0x70] sm:$0xff] }
  0x2f   : > { %353 = vperm.xlu2 %2314, %v211_v11   ;;  %v254_v11 = vld [vmem:[%s2460_s5 + $0x1a0] sm:$0xff] }
  0x30   : > { %350 = vperm.xlu1 %2313, %v210_v10   ;;  %2263 = vmatpush.bf16.msra.mxu3 %v2045_v2  ;;  %v255_v10 = vld [vmem:[%s2460_s5 + $0x1a8] sm:$0xff] }
  0x31   : > { %273 = vperm.xlu0 %2312, %v203_v12   ;;  %1138 = vmatpush.bf16.msra.mxu1 %v2045_v2  ;;  %v262_v12 = vld [vmem:[%s2460_s5 + $0x1e0] sm:$0xff] }
  0x34   : > { %2264 = vmatpush.bf16.msra.mxu3 %v2033_v9 }
  0x35   : > { %1139 = vmatpush.bf16.msra.mxu1 %v2033_v9  ;;  %v209_v9 = vld [vmem:[%s2460_s5 + $0x38] sm:$0xff] }
  0x37   : > { %574 = vperm.xlu2 %2314, %v226_v14   ;;  %v2207_v14 = vld [vmem:[%s3615_s1 + $0x20] sm:$0xf0] }
  0x38   : > { %465 = vperm.xlu1 %2313, %v219_v13   ;;  %v1924_v13 = vld [vmem:[%s3615_s1 + $0x18] sm:$0xf] }
  0x39   : > { %462 = vperm.xlu0 %2312, %v218_v15   ;;  %v2020_v15 = vld [vmem:[%s3615_s1 + $0xd8] sm:$0xf] }
  0x3f   : > { %303 = vperm.xlu2 %2314, %v237_v17   ;;  %v2231_v17 = vld [vmem:[%s3615_s1 + $0xe0] sm:$0xf0] }
  0x40   : > { %300 = vperm.xlu1 %2313, %v236_v16   ;;  %v1925_v16 = vor.u32 %v2207_v14, %v1924_v13  ;;  %v225_v14 = vld [vmem:[%s2460_s5 + $0xb8] sm:$0xff] }
  0x41   : > { %577 = vperm.xlu0 %2312, %v227_v18   ;;  %v2021_v18 = vor.u32 %v2231_v17, %v2020_v15  ;;  %v232_v15 = vld [vmem:[%s2460_s5 + $0xf0] sm:$0xff] }
  0x42   : > { %2257 = vmatpush.bf16.msra.mxu2 %v1925_v16  ;;  %1091 = vmatpush.bf16.msra.mxu0 %v1925_v16  ;;  %v3667_v16 = vmov 0  ;;  %v224_v17 = vld [vmem:[%s2460_s5 + $0xb0] sm:$0xff] }
  0x43   : > { %2265 = vmatpush.bf16.msra.mxu3 %v2021_v18  ;;  %1140 = vmatpush.bf16.msra.mxu1 %v2021_v18 }
  0x47   : > { %492 = vperm.xlu2 %2314, %v252_v20   ;;  %v1912_v20 = vld [vmem:[%s3615_s1] sm:$0xf] }
  0x48   : > { %383 = vperm.xlu1 %2313, %v245_v19  }
  0x49   : > { %380 = vperm.xlu0 %2312, %v244_v21   ;;  %v2204_v21 = vld [vmem:[%s3615_s1 + $0x8] sm:$0xf0] }
  0x4f   : > { %607 = vperm.xlu2 %2314, %v261_v23   ;;  %v1913_v23 = vor.u32 %v2204_v21, %v1912_v20 }
  0x50   : > { %604 = vperm.xlu1 %2313, %v260_v22   ;;  %v2008_v22 = vld [vmem:[%s3615_s1 + $0xc0] sm:$0xf] }
  0x51   : > { %495 = vperm.xlu0 %2312, %v253_v24   ;;  %v2228_v24 = vld [vmem:[%s3615_s1 + $0xc8] sm:$0xf0]  ;;  %2258 = vmatpush.bf16.msra.mxu2 %v1913_v23 }
  0x52   : > { %1092 = vmatpush.bf16.msra.mxu0 %v1913_v23  ;;  %v233_v23 = vld [vmem:[%s2460_s5 + $0xf8] sm:$0xff] }
  0x57   : > { %356 = vperm.xlu2 %2314, %v212_v26   ;;  %v206_v26 = vld [vmem:[%s2460_s5 + $0x20] sm:$0xff] }
  0x58   : > { %279 = vperm.xlu1 %2313, %v205_v25   ;;  %v2009_v25 = vor.u32 %v2228_v24, %v2008_v22  ;;  %v1974_v22 = vld [vmem:[%s3615_s1 + $0x84] sm:$0xf0] }
  0x59   : > { %276 = vperm.xlu0 %2312, %v204_v27   ;;  %v207_v27 = vld [vmem:[%s2460_s5 + $0x28] sm:$0xff] }
  0x5a   : > { %2266 = vmatpush.bf16.msra.mxu3 %v2009_v25  ;;  %1141 = vmatpush.bf16.msra.mxu1 %v2009_v25 }
  0x5f   : > { %471 = vperm.xlu2 %2314, %v221_v34   ;;  %v2610_v34 = vand.u32 127, %v266_v32 }
  0x60   : > { %468 = vperm.xlu1 %2313, %v220_v33   ;;  %v214_v33 = vld [vmem:[%s2460_s5 + $0x60] sm:$0xff] }
  0x61   : > { %359 = vperm.xlu0 %2312, %v213_v36   ;;  %v2617_v40 = vadd.s32 128, %v2610_v34 }
  0x67   : > { %306 = vperm.xlu2 %2314, %v238_v48   ;;  %v240_v48 = vld [vmem:[%s2460_s5 + $0x130] sm:$0xff] }
  0x68   : > { %583 = vperm.xlu1 %2313, %v229_v47   ;;  %v248_v47 = vld [vmem:[%s2460_s5 + $0x170] sm:$0xff] }
  0x69   : > { %580 = vperm.xlu0 %2312, %v228_v50   ;;  %v3686_v50 = vmov 0 }
  0x6f   : > { %389 = vperm.xlu2 %2314, %v247_v60  }
  0x70   : > { %386 = vperm.xlu1 %2313, %v246_v58   ;;  %v2380_v58 = vmov 1.0|1.0  }
  0x71   : > { %309 = vperm.xlu0 %2312, %v239_v59   ;;  %v2558_v3 = vpop.permute.xlu2 %486  ;;  %v3657_v59 = vmov 0 }
  0x72   : > { %vm525_vm4 = vcmp.eq.s32.totalorder %v2610_v34, %v2558_v3  ;;  %vm526_vm11 = vcmp.eq.s32.totalorder %v2617_v40, %v2558_v3  ;;  %v2217_v3 = vld [vmem:[%s3615_s1 + $0x70] sm:$0xf0] }
  0x77   : > { %610 = vperm.xlu2 %2314, %v262_v12  }
  0x78   : > { %501 = vperm.xlu1 %2313, %v255_v10  }
  0x79   : > { %498 = vperm.xlu0 %2312, %v254_v11   ;;  %v2587_v19 = vpop.permute.xlu2 %489  ;;  %v1992_v11 = vld [vmem:[%s3615_s1 + $0x98] sm:$0xf] }
  0x7a   : > { %vm527_vm13 = vcmp.eq.s32.totalorder %v2610_v34, %v2587_v19  ;;  %vm528_vm15 = vcmp.eq.s32.totalorder %v2617_v40, %v2587_v19  ;;  %v3669_v19 = vmov 0 }
  0x7f   : > { %285 = vperm.xlu2 %2314, %v207_v27  }
  0x80   : > { %282 = vperm.xlu1 %2313, %v206_v26  }
  0x81   : > { %613 = vperm.xlu0 %2312, %v263_v28   ;;  %v2604_v29 = vpop.permute.xlu2 %270  ;;  %v3675_v28 = vmov 0 }
  0x87   : > { %474 = vperm.xlu2 %2314, %v222_v31   ;;  %v3677_v31 = vmov 0 }
  0x88   : > { %365 = vperm.xlu1 %2313, %v215_v30  }
  0x89   : > { %362 = vperm.xlu0 %2312, %v214_v33   ;;  %v2612_v36 = vpop.permute.xlu2 %353 }
  0x8a   : > { %v375_v35 = vpop.permute.xlu1 %374 }
  0x8b   : > { %v295_v37 = vpop.permute.xlu0 %294  ;;  %vm413_vm0 = vcmp.eq.s32.totalorder %v2610_v34, %v375_v35  ;;  %vm414_vm2 = vcmp.eq.s32.totalorder %v2617_v40, %v375_v35 }
  0x8c   : > { %vm333_vm1 = vcmp.eq.s32.totalorder %v2610_v34, %v295_v37  ;;  %vm334_vm3 = vcmp.eq.s32.totalorder %v2617_v40, %v295_v37 }
  0x8d   : > { %vm445_vm5 = vmor %vm333_vm1, %vm413_vm0 }
  0x8e   : > { %vm2630_vm8 = vmor %vm334_vm3, %vm414_vm2 }
  0x8f   : > { %589 = vperm.xlu2 %2314, %v231_v39   ;;  %vm2641_vm12 = vmor %vm445_vm5, %vm525_vm4  ;;  %v3704_v39 = vmov 0 }
  0x90   : > { %586 = vperm.xlu1 %2313, %v230_v38   ;;  %vm2651_vm1 = vmor %vm2630_vm8, %vm526_vm11  ;;  %v3679_v38 = vmov 0 }
  0x91   : > { %477 = vperm.xlu0 %2312, %v223_v41   ;;  %v2624_v43 = vpop.permute.xlu2 %574 }
  0x92   : > { %v378_v42 = vpop.permute.xlu1 %377 }
  0x93   : > { %v298_v44 = vpop.permute.xlu0 %297  ;;  %vm415_vm6 = vcmp.eq.s32.totalorder %v2610_v34, %v378_v42  ;;  %vm416_vm9 = vcmp.eq.s32.totalorder %v2617_v40, %v378_v42 }
  0x94   : > { %vm335_vm7 = vcmp.eq.s32.totalorder %v2610_v34, %v298_v44  ;;  %vm336_vm10 = vcmp.eq.s32.totalorder %v2617_v40, %v298_v44 }
  0x95   : > { %vm447_vm14 = vmor %vm335_vm7, %vm415_vm6 }
  0x96   : > { %vm448_vm0 = vmor %vm336_vm10, %vm416_vm9 }
  0x97   : > { %392 = vperm.xlu2 %2314, %v248_v47   ;;  %vm559_vm2 = vmor %vm447_vm14, %vm527_vm13 }
  0x98   : > { %315 = vperm.xlu1 %2313, %v241_v46   ;;  %vm560_vm4 = vmor %vm448_vm0, %vm528_vm15  ;;  %vm317_vm0 = vcmp.eq.s32.totalorder %v2610_v34, %v2604_v29  ;;  %v1998_v46 = vld [vmem:[%s3615_s1 + $0xb4] sm:$0xf0] }
  0x99   : > { %312 = vperm.xlu0 %2312, %v240_v48   ;;  %v2655_v52 = vpop.permute.xlu2 %303  ;;  %v2001_v47 = vor.u32 %v2224_v45, %v1998_v46  ;;  %v2248_v48 = vld [vmem:[%s3615_s1 + $0x16c] sm:$0xf]  ;;  %v2215_v46 = vld [vmem:[%s3615_s1 + $0x64] sm:$0xf] }
  0x9a   : > { %v602_v51 = vpop.permute.xlu1 %601 }
  0x9b   : > { %vm639_vm3 = vcmp.eq.s32.totalorder %v2610_v34, %v602_v51  ;;  %v599_v53 = vpop.permute.xlu0 %598  ;;  %vm640_vm9 = vcmp.eq.s32.totalorder %v2617_v40, %v602_v51  ;;  %v2097_v51 = vor.u32 %v2248_v48, %v2094_v49  ;;  %1183 = vmatpush.bf16.msrb.mxu2 %v2001_v47  ;;  %v1962_v47 = vld [vmem:[%s3615_s1 + $0x6c] sm:$0xf0]  ;;  %v2239_v48 = vld [vmem:[%s3615_s1 + $0x124] sm:$0xf] }
  0x9c   : > { %vm637_vm5 = vcmp.eq.s32.totalorder %v2610_v34, %v599_v53  ;;  %vm638_vm6 = vcmp.eq.s32.totalorder %v2617_v40, %v599_v53  ;;  %vm671_vm7 = vmor %vm559_vm2, %vm639_vm3  ;;  %vm318_vm2 = vcmp.eq.s32.totalorder %v2617_v40, %v2604_v29 }
  0x9d   : > { %vm669_vm8 = vmor %vm2641_vm12, %vm637_vm5  ;;  %vm399_vm5 = vcmp.eq.s32.totalorder %v2610_v34, %v2612_v36  ;;  %1232 = vmatpush.bf16.msrb.mxu3 %v2097_v51  ;;  %v1965_v51 = vor.u32 %v2215_v46, %v1962_v47 }
  0x9e   : > { %vm2665_vm10 = vmpackc.low %vm671_vm7, %vm669_vm8 }
  0x9f   : > { %v3656_v56 = vsel %vm2665_vm10, 4294967295, %v3655_v56  ;;  %2111 = vmatmul.msk.bf16.vlgmr.msra.gmra.mxu2 %vm2665_vm10, %v2380_v58  ;;  %vm670_vm11 = vmor %vm2651_vm1, %vm638_vm6  ;;  %507 = vperm.xlu2 %2314, %v257_v55   ;;  %v2226_v55 = vld [vmem:[%s3615_s1 + $0xb8] sm:$0xf0] }
  0xa0   : > { %vm672_vm13 = vmor %vm560_vm4, %vm640_vm9  ;;  %504 = vperm.xlu1 %2313, %v256_v54   ;;  %vm400_vm9 = vcmp.eq.s32.totalorder %v2617_v40, %v2612_v36  ;;  %v2004_v54 = vld [vmem:[%s3615_s1 + $0xb0] sm:$0xf] }
  0xa1   : > { %vm2675_vm12 = vmpackc.low %vm672_vm13, %vm670_vm11  ;;  %395 = vperm.xlu0 %2312, %v249_v57   ;;  %v2682_v62 = vpop.permute.xlu2 %492  ;;  %v2005_v57 = vor.u32 %v2226_v55, %v2004_v54 }
  0xa2   : > { %v3658_v59 = vsel %vm2675_vm12, 4294967295, %v3657_v59  ;;  %2127 = vmatmul.msk.bf16.vlgmr.msra.gmra.mxu3 %vm2675_vm12, %v2380_v58  ;;  %v351_v60 = vpop.permute.xlu1 %350 }
  0xa3   : > { %v274_v61 = vpop.permute.xlu0 %273  ;;  %vm397_vm14 = vcmp.eq.s32.totalorder %v2610_v34, %v351_v60  ;;  %vm398_vm15 = vcmp.eq.s32.totalorder %v2617_v40, %v351_v60  ;;  %v2100_v60 = vld [vmem:[%s3615_s1 + $0x170] sm:$0xf]  ;;  %1281 = vmatpush.bf16.msrb.mxu0 %v2005_v57 }
  0xa4   : > { %vm319_vm1 = vcmp.eq.s32.totalorder %v2610_v34, %v274_v61  ;;  %vm2694_vm3 = vmor %vm317_vm0, %vm397_vm14  ;;  %vm320_vm4 = vcmp.eq.s32.totalorder %v2617_v40, %v274_v61  ;;  %v2250_v61 = vld [vmem:[%s3615_s1 + $0x178] sm:$0xf0] }
  0xa5   : > { %vm2701_vm6 = vmor %vm318_vm2, %vm398_vm15 }
  0xa6   : > { %vm431_vm8 = vmor %vm319_vm1, %vm399_vm5 }
  0xa7   : > { %288 = vperm.xlu2 %2314, %v208_v0   ;;  %vm432_vm13 = vmor %vm320_vm4, %vm400_vm9  ;;  %vm621_vm4 = vcmp.eq.s32.totalorder %v2610_v34, %v2624_v43 }
  0xa8   : > { %619 = vperm.xlu1 %2313, %v265_v63  }
  0xa9   : > { %616 = vperm.xlu0 %2312, %v264_v1   ;;  %v2709_v6 = vpop.permute.xlu2 %607 }
  0xaa   : > { %v466_v2 = vpop.permute.xlu1 %465 }
  0xab   : > { %v463_v4 = vpop.permute.xlu0 %462  ;;  %vm511_vm7 = vcmp.eq.s32.totalorder %v2610_v34, %v466_v2  ;;  %vm512_vm15 = vcmp.eq.s32.totalorder %v2617_v40, %v466_v2 }
  0xac   : > { %vm509_vm11 = vcmp.eq.s32.totalorder %v2610_v34, %v463_v4  ;;  %vm510_vm14 = vcmp.eq.s32.totalorder %v2617_v40, %v463_v4  ;;  %vm2716_vm0 = vmor %vm431_vm8, %vm511_vm7  ;;  %vm622_vm7 = vcmp.eq.s32.totalorder %v2617_v40, %v2624_v43  ;;  %v3684_v43 = vmov 0  ;;  %v2221_v4 = vld [vmem:[%s3615_s1 + $0x94] sm:$0xf] }
  0xad   : > { %vm541_vm1 = vmor %vm2694_vm3, %vm509_vm11 }
  0xae   : > { %vm542_vm2 = vmor %vm2701_vm6, %vm510_vm14 }
  0xaf   : > { %371 = vperm.xlu2 %2314, %v217_v8   ;;  %vm2726_vm5 = vmor %vm432_vm13, %vm512_vm15  ;;  %v2082_v8 = vld [vmem:[%s3615_s1 + $0x15c] sm:$0xf0] }
  0xb0   : > { %368 = vperm.xlu1 %2313, %v216_v7   ;;  %vm653_vm3 = vmor %vm541_vm1, %vm621_vm4  ;;  %v2245_v7 = vld [vmem:[%s3615_s1 + $0x154] sm:$0xf] }
  0xb1   : > { %291 = vperm.xlu0 %2312, %v209_v9   ;;  %vm654_vm11 = vmor %vm542_vm2, %vm622_vm7  ;;  %v357_v18 = vpop.permute.xlu2 %356  ;;  %vm339_vm2 = vcmp.eq.s32.totalorder %v2610_v34, %v2655_v52  ;;  %v2085_v10 = vor.u32 %v2245_v7, %v2082_v8  ;;  %v2241_v7 = vld [vmem:[%s3615_s1 + $0x130] sm:$0xf0]  ;;  %v2236_v8 = vld [vmem:[%s3615_s1 + $0x10c] sm:$0xf] }
  0xb2   : > { %v301_v12 = vpop.permute.xlu1 %300  ;;  %v2046_v9 = vld [vmem:[%s3615_s1 + $0x114] sm:$0xf0] }
  0xb3   : > { %v578_v13 = vpop.permute.xlu0 %577  ;;  %1233 = vmatpush.bf16.msrb.mxu3 %v2085_v10  ;;  %v1932_v10 = vld [vmem:[%s3615_s1 + $0x20] sm:$0xf] }
  0xb4   : > { %vm623_vm9 = vcmp.eq.s32.totalorder %v2610_v34, %v578_v13  ;;  %vm624_vm8 = vcmp.eq.s32.totalorder %v2617_v40, %v578_v13  ;;  %v2049_v13 = vor.u32 %v2236_v8, %v2046_v9  ;;  %v3728_v9 = vmov 0 }
  0xb5   : > { %vm655_vm6 = vmor %vm2716_vm0, %vm623_vm9  ;;  %vm338_vm9 = vcmp.eq.s32.totalorder %v2617_v40, %v301_v12 }
  0xb6   : > { %vm2738_vm13 = vmpackc.low %vm655_vm6, %vm653_vm3 }
  0xb7   : > { %v3668_v16 = vsel %vm2738_vm13, 4294967295, %v3667_v16  ;;  %2103 = vmatmul.msk.bf16.vlgmr.msra.gmra.mxu0 %vm2738_vm13, %v2380_v58  ;;  %vm656_vm14 = vmor %vm2726_vm5, %vm624_vm8  ;;  %592 = vperm.xlu2 %2314, %v232_v15   ;;  %vm337_vm5 = vcmp.eq.s32.totalorder %v2610_v34, %v301_v12  ;;  %v2223_v12 = vld [vmem:[%s3615_s1 + $0xa0] sm:$0xf0]  ;;  %v2088_v15 = vld [vmem:[%s3615_s1 + $0x158] sm:$0xf] }
  0xb8   : > { %vm2748_vm15 = vmpackc.low %vm656_vm14, %vm654_vm11  ;;  %483 = vperm.xlu1 %2313, %v225_v14   ;;  %vm340_vm11 = vcmp.eq.s32.totalorder %v2617_v40, %v2655_v52  ;;  %vm529_vm14 = vcmp.eq.s32.totalorder %v2610_v34, %v2682_v62  ;;  %v1993_v14 = vor.u32 %v2223_v12, %v1992_v11 }
  0xb9   : > { %v3670_v19 = vsel %vm2748_vm15, 4294967295, %v3669_v19  ;;  %2119 = vmatmul.msk.bf16.vlgmr.msra.gmra.mxu1 %vm2748_vm15, %v2380_v58  ;;  %480 = vperm.xlu0 %2312, %v224_v17   ;;  %v472_v25 = vpop.permute.xlu2 %471  ;;  %v2247_v17 = vld [vmem:[%s3615_s1 + $0x160] sm:$0xf0] }
  0xba   : > { %v384_v20 = vpop.permute.xlu1 %383  ;;  %1282 = vmatpush.bf16.msrb.mxu0 %v1993_v14  ;;  %v2209_v14 = vld [vmem:[%s3615_s1 + $0x34] sm:$0xf] }
  0xbb   : > { %vm419_vm0 = vcmp.eq.s32.totalorder %v2610_v34, %v384_v20  ;;  %v381_v21 = vpop.permute.xlu0 %380  ;;  %vm420_vm7 = vcmp.eq.s32.totalorder %v2617_v40, %v384_v20  ;;  %v2089_v20 = vor.u32 %v2247_v17, %v2088_v15  ;;  %v1938_v15 = vld [vmem:[%s3615_s1 + $0x3c] sm:$0xf0]  ;;  %v2232_v17 = vld [vmem:[%s3615_s1 + $0xe8] sm:$0xf0] }
  0xbc   : > { %vm417_vm1 = vcmp.eq.s32.totalorder %v2610_v34, %v381_v21  ;;  %vm418_vm4 = vcmp.eq.s32.totalorder %v2617_v40, %v381_v21  ;;  %vm2762_vm3 = vmor %vm339_vm2, %vm419_vm0  ;;  %vm530_vm0 = vcmp.eq.s32.totalorder %v2617_v40, %v2682_v62  ;;  %v2101_v62 = vor.u32 %v2250_v61, %v2100_v60  ;;  %v2218_v21 = vld [vmem:[%s3615_s1 + $0x7c] sm:$0xf] }
  0xbd   : > { %vm449_vm8 = vmor %vm337_vm5, %vm417_vm1  ;;  %v1977_v24 = vor.u32 %v2218_v21, %v1974_v22  ;;  %v2034_v22 = vld [vmem:[%s3615_s1 + $0xfc] sm:$0xf0] }
  0xbe   : > { %vm450_vm6 = vmor %vm338_vm9, %vm418_vm4  ;;  %1330 = vmatpush.bf16.msrb.mxu1 %v2101_v62 }
  0xbf   : > { %vm2772_vm12 = vmor %vm340_vm11, %vm420_vm7  ;;  %vm643_vm11 = vcmp.eq.s32.totalorder %v2610_v34, %v2709_v6 }
  0xc0   : > { %vm561_vm2 = vmor %vm449_vm8, %vm529_vm14 }
  0xc1   : > { %595 = vperm.xlu0 %2312, %v233_v23   ;;  %vm562_vm5 = vmor %vm450_vm6, %vm530_vm0  ;;  %vm644_vm6 = vcmp.eq.s32.totalorder %v2617_v40, %v2709_v6  ;;  %v2797_v30 = vpop.permute.xlu2 %306  ;;  %v1989_v6 = vor.u32 %v2221_v4, %v1986_v5  ;;  %v2064_v4 = vld [vmem:[%s3615_s1 + $0x128] sm:$0xf]  ;;  %v3718_v23 = vmov 0 }
  0xc2   : > { %v605_v26 = vpop.permute.xlu1 %604  ;;  %1331 = vmatpush.bf16.msrb.mxu1 %v2089_v20  ;;  %v2065_v12 = vor.u32 %v2241_v7, %v2064_v4  ;;  %v2233_v20 = vld [vmem:[%s3615_s1 + $0xf4] sm:$0xf]  ;;  %v3726_v4 = vmov 0  ;;  %v2235_v7 = vld [vmem:[%s3615_s1 + $0x100] sm:$0xf0] }
  0xc3   : > { %vm641_vm1 = vcmp.eq.s32.totalorder %v2610_v34, %v605_v26  ;;  %v496_v27 = vpop.permute.xlu0 %495  ;;  %vm642_vm15 = vcmp.eq.s32.totalorder %v2617_v40, %v605_v26  ;;  %1184 = vmatpush.bf16.msrb.mxu2 %v1989_v6  ;;  %v2070_v26 = vld [vmem:[%s3615_s1 + $0x144] sm:$0xf0] }
  0xc4   : > { %vm531_vm4 = vcmp.eq.s32.totalorder %v2610_v34, %v496_v27  ;;  %vm532_vm9 = vcmp.eq.s32.totalorder %v2617_v40, %v496_v27  ;;  %vm673_vm10 = vmor %vm561_vm2, %vm641_vm1 }
  0xc5   : > { %vm563_vm7 = vmor %vm2762_vm3, %vm531_vm4 }
  0xc6   : > { %vm564_vm8 = vmor %vm2772_vm12, %vm532_vm9 }
  0xc7   : > { %vm675_vm14 = vmor %vm563_vm7, %vm643_vm11  ;;  %1185 = vmatpush.bf16.msrb.mxu2 %v1977_v24  ;;  %v2037_v24 = vor.u32 %v2233_v20, %v2034_v22 }
  0xc8   : > { %vm2788_vm13 = vmpackc.low %vm675_vm14, %vm673_vm10 }
  0xc9   : > { %v3676_v28 = vsel %vm2788_vm13, 4294967295, %v3675_v28  ;;  %2113 = vmatmul.msk.bf16.gmra.mxu2 %vm2788_vm13, %v2380_v58  ;;  %vm674_vm3 = vmor %vm562_vm5, %vm642_vm15  ;;  %vm401_vm15 = vcmp.eq.s32.totalorder %v2610_v34, %v357_v18  ;;  %vm402_vm5 = vcmp.eq.s32.totalorder %v2617_v40, %v357_v18  ;;  %v2812_v37 = vpop.permute.xlu2 %389  ;;  %v1941_v18 = vor.u32 %v2209_v14, %v1938_v15  ;;  %v2028_v15 = vld [vmem:[%s3615_s1 + $0xe0] sm:$0xf] }
  0xca   : > { %vm676_vm0 = vmor %vm564_vm8, %vm644_vm6  ;;  %v280_v29 = vpop.permute.xlu1 %279  ;;  %v2029_v20 = vor.u32 %v2232_v17, %v2028_v15 }
  0xcb   : > { %vm2799_vm2 = vmpackc.low %vm676_vm0, %vm674_vm3  ;;  %v277_v33 = vpop.permute.xlu0 %276  ;;  %vm323_vm8 = vcmp.eq.s32.totalorder %v2610_v34, %v280_v29  ;;  %vm324_vm3 = vcmp.eq.s32.totalorder %v2617_v40, %v280_v29  ;;  %1186 = vmatpush.bf16.msrb.mxu2 %v1965_v51 }
  0xcc   : > { %v3678_v31 = vsel %vm2799_vm2, 4294967295, %v3677_v31  ;;  %2129 = vmatmul.msk.bf16.gmra.mxu3 %vm2799_vm2, %v2380_v58  ;;  %vm321_vm10 = vcmp.eq.s32.totalorder %v2610_v34, %v277_v33  ;;  %vm322_vm12 = vcmp.eq.s32.totalorder %v2617_v40, %v277_v33 }
  0xcd   : > { %vm433_vm4 = vmor %vm321_vm10, %vm401_vm15  ;;  %vm515_vm10 = vcmp.eq.s32.totalorder %v2610_v34, %v472_v25 }
  0xce   : > { %vm434_vm7 = vmor %vm322_vm12, %vm402_vm5  ;;  %vm516_vm12 = vcmp.eq.s32.totalorder %v2617_v40, %v472_v25  ;;  %v2242_v25 = vld [vmem:[%s3615_s1 + $0x13c] sm:$0xf] }
  0xd1   : > { %v2838_v44 = vpop.permute.xlu2 %610 }
  0xd2   : > { %v469_v35 = vpop.permute.xlu1 %468 }
  0xd3   : > { %vm513_vm1 = vcmp.eq.s32.totalorder %v2610_v34, %v469_v35  ;;  %v360_v36 = vpop.permute.xlu0 %359  ;;  %vm514_vm14 = vcmp.eq.s32.totalorder %v2617_v40, %v469_v35 }
  0xd4   : > { %vm403_vm9 = vcmp.eq.s32.totalorder %v2610_v34, %v360_v36  ;;  %vm404_vm11 = vcmp.eq.s32.totalorder %v2617_v40, %v360_v36  ;;  %vm2817_vm6 = vmor %vm433_vm4, %vm513_vm1  ;;  %v3702_v36 = vmov 0 }
  0xd5   : > { %v3680_v38 = vsel %vm2817_vm6, 4294967295, %v3679_v38  ;;  %vm435_vm0 = vmor %vm323_vm8, %vm403_vm9 }
  0xd6   : > { %vm436_vm2 = vmor %vm324_vm3, %vm404_vm11 }
  0xd7   : > { %vm2823_vm15 = vmor %vm434_vm7, %vm514_vm14  ;;  %vm3683_vm7 = vnez %v3680_v38  ;;  %v2220_v38 = vld [vmem:[%s3615_s1 + $0x88] sm:$0xf0] }
  0xd8   : > { %vm547_vm5 = vmor %vm435_vm0, %vm515_vm10  ;;  %vm341_vm10 = vcmp.eq.s32.totalorder %v2610_v34, %v2797_v30 }
  0xd9   : > { %vm548_vm1 = vmor %vm436_vm2, %vm516_vm12  ;;  %v2877_v63 = vpop.permute.xlu2 %285  ;;  %vm342_vm12 = vcmp.eq.s32.totalorder %v2617_v40, %v2797_v30  ;;  %v2073_v30 = vor.u32 %v2242_v25, %v2070_v26  ;;  %v1956_v25 = vld [vmem:[%s3615_s1 + $0x50] sm:$0xf]  ;;  %v2214_v26 = vld [vmem:[%s3615_s1 + $0x58] sm:$0xf0] }
  0xda   : > { %v584_v41 = vpop.permute.xlu1 %583  ;;  %v1957_v27 = vor.u32 %v2214_v26, %v1956_v25  ;;  %v2205_v25 = vld [vmem:[%s3615_s1 + $0x10] sm:$0xf0] }
  0xdb   : > { %vm627_vm13 = vcmp.eq.s32.totalorder %v2610_v34, %v584_v41  ;;  %v581_v42 = vpop.permute.xlu0 %580  ;;  %vm628_vm11 = vcmp.eq.s32.totalorder %v2617_v40, %v584_v41  ;;  %1234 = vmatpush.bf16.msrb.mxu3 %v2073_v30  ;;  %v2238_v30 = vld [vmem:[%s3615_s1 + $0x118] sm:$0xf0] }
  0xdc   : > { %vm625_vm4 = vcmp.eq.s32.totalorder %v2610_v34, %v581_v42  ;;  %vm626_vm6 = vcmp.eq.s32.totalorder %v2617_v40, %v581_v42  ;;  %vm659_vm9 = vmor %vm547_vm5, %vm627_vm13  ;;  %v2076_v42 = vld [vmem:[%s3615_s1 + $0x140] sm:$0xf] }
  0xdd   : > { %vm657_vm8 = vmor %vm3683_vm7, %vm625_vm4  ;;  %vm423_vm4 = vcmp.eq.s32.totalorder %v2610_v34, %v2812_v37  ;;  %vm424_vm7 = vcmp.eq.s32.totalorder %v2617_v40, %v2812_v37  ;;  %v1980_v37 = vld [vmem:[%s3615_s1 + $0x80] sm:$0xf] }
  0xde   : > { %vm2834_vm14 = vmpackc.low %vm659_vm9, %vm657_vm8  ;;  %v1981_v41 = vor.u32 %v2220_v38, %v1980_v37  ;;  %v2206_v37 = vld [vmem:[%s3615_s1 + $0x1c] sm:$0xf]  ;;  %v1926_v38 = vld [vmem:[%s3615_s1 + $0x24] sm:$0xf0] }
  0xdf   : > { %v3685_v43 = vsel %vm2834_vm14, 4294967295, %v3684_v43  ;;  %2105 = vmatmul.msk.bf16.gmra.mxu0 %vm2834_vm14, %v2380_v58  ;;  %vm658_vm2 = vmor %vm2823_vm15, %vm626_vm6  ;;  %v1929_v46 = vor.u32 %v2206_v37, %v1926_v38 }
  0xe0   : > { %vm660_vm13 = vmor %vm548_vm1, %vm628_vm11  ;;  %1283 = vmatpush.bf16.msrb.mxu0 %v1981_v41  ;;  %v3720_v41 = vmov 0 }
  0xe1   : > { %vm2857_vm3 = vmpackc.low %vm660_vm13, %vm658_vm2  ;;  %v475_v33 = vpop.permute.xlu2 %474 }
  0xe2   : > { %v3687_v50 = vsel %vm2857_vm3, 4294967295, %v3686_v50  ;;  %2121 = vmatmul.msk.bf16.gmra.mxu1 %vm2857_vm3, %v2380_v58  ;;  %v387_v52 = vpop.permute.xlu1 %386 }
  0xe3   : > { %v310_v53 = vpop.permute.xlu0 %309  ;;  %vm421_vm6 = vcmp.eq.s32.totalorder %v2610_v34, %v387_v52  ;;  %vm422_vm0 = vcmp.eq.s32.totalorder %v2617_v40, %v387_v52  ;;  %v2058_v52 = vld [vmem:[%s3615_s1 + $0x12c] sm:$0xf0] }
  0xe4   : > { %vm343_vm15 = vcmp.eq.s32.totalorder %v2610_v34, %v310_v53  ;;  %vm2885_vm5 = vmor %vm341_vm10, %vm421_vm6  ;;  %vm344_vm1 = vcmp.eq.s32.totalorder %v2617_v40, %v310_v53  ;;  %v2061_v55 = vor.u32 %v2239_v48, %v2058_v52  ;;  %v2203_v48 = vld [vmem:[%s3615_s1 + $0x4] sm:$0xf] }
  0xe5   : > { %vm2892_vm9 = vmor %vm342_vm12, %vm422_vm0  ;;  %v2227_v52 = vld [vmem:[%s3615_s1 + $0xc4] sm:$0xf] }
  0xe6   : > { %vm455_vm8 = vmor %vm343_vm15, %vm423_vm4  ;;  %vm646_vm4 = vcmp.eq.s32.totalorder %v2617_v40, %v2838_v44  ;;  %1235 = vmatpush.bf16.msrb.mxu3 %v2061_v55 }
  0xe7   : > { %vm2912_vm13 = vmor %vm344_vm1, %vm424_vm7 }
  0xe9   : > { %v590_v57 = vpop.permute.xlu2 %589 }
  0xea   : > { %v502_v0 = vpop.permute.xlu1 %501  ;;  %1236 = vmatpush.bf16.msrb.mxu3 %v2049_v13 }
  0xeb   : > { %v499_v2 = vpop.permute.xlu0 %498  ;;  %vm535_vm11 = vcmp.eq.s32.totalorder %v2610_v34, %v502_v0  ;;  %vm536_vm0 = vcmp.eq.s32.totalorder %v2617_v40, %v502_v0  ;;  %v1950_v0 = vld [vmem:[%s3615_s1 + $0x54] sm:$0xf0] }
  0xec   : > { %vm533_vm2 = vcmp.eq.s32.totalorder %v2610_v34, %v499_v2  ;;  %vm534_vm6 = vcmp.eq.s32.totalorder %v2617_v40, %v499_v2  ;;  %vm2926_vm10 = vmor %vm455_vm8, %vm535_vm11  ;;  %v1968_v2 = vld [vmem:[%s3615_s1 + $0x68] sm:$0xf] }
  0xed   : > { %vm2940_vm15 = vmor %vm2885_vm5, %vm533_vm2  ;;  %vm645_vm5 = vcmp.eq.s32.totalorder %v2610_v34, %v2838_v44  ;;  %v2244_v44 = vld [vmem:[%s3615_s1 + $0x148] sm:$0xf0]  ;;  %v1969_v11 = vor.u32 %v2217_v3, %v1968_v2  ;;  %v1944_v2 = vld [vmem:[%s3615_s1 + $0x38] sm:$0xf] }
  0xee   : > { %vm2954_vm12 = vmor %vm2892_vm9, %vm534_vm6  ;;  %v2077_v45 = vor.u32 %v2244_v44, %v2076_v42  ;;  %1237 = vmatpush.bf16.msrb.mxu3 %v2037_v24  ;;  %v2230_v44 = vld [vmem:[%s3615_s1 + $0xdc] sm:$0xf]  ;;  %v2211_v3 = vld [vmem:[%s3615_s1 + $0x40] sm:$0xf0] }
  0xef   : > { %vm2970_vm1 = vmor %vm2912_vm13, %vm536_vm0  ;;  %1284 = vmatpush.bf16.msrb.mxu0 %v1969_v11  ;;  %v2208_v11 = vld [vmem:[%s3615_s1 + $0x28] sm:$0xf0]  ;;  %v1920_v24 = vld [vmem:[%s3615_s1 + $0x8] sm:$0xf] }
  0xf0   : > { %vm677_vm9 = vmor %vm2940_vm15, %vm645_vm5  ;;  %1332 = vmatpush.bf16.msrb.mxu1 %v2077_v45  ;;  %vm328_vm5 = vcmp.eq.s32.totalorder %v2617_v40, %v2877_v63  ;;  %v2022_v45 = vld [vmem:[%s3615_s1 + $0xe4] sm:$0xf0]  ;;  %v1933_v14 = vor.u32 %v2208_v11, %v1932_v10 }
  0xf1   : > { %vm678_vm8 = vmor %vm2954_vm12, %vm646_vm4  ;;  %v393_v21 = vpop.permute.xlu2 %392  ;;  %v2025_v47 = vor.u32 %v2230_v44, %v2022_v45  ;;  %v3264_v45 = vld [vmem:[%s3617_s3] sm:$0xff] }
  0xf2   : > { %v283_v29 = vpop.permute.xlu1 %282 }
  0xf3   : > { %v614_v35 = vpop.permute.xlu0 %613  ;;  %1285 = vmatpush.bf16.msrb.mxu0 %v1957_v27  ;;  %1238 = vmatpush.bf16.msrb.mxu3 %v2025_v47  ;;  %v1921_v27 = vor.u32 %v2205_v25, %v1920_v24  ;;  %v3269_v47 = vld [vmem:[%s3617_s3 + $0x18] sm:$0xff] }
  0xf4   : > { %vm647_vm11 = vcmp.eq.s32.totalorder %v2610_v34, %v614_v35  ;;  %vm648_vm7 = vcmp.eq.s32.totalorder %v2617_v40, %v614_v35  ;;  %1333 = vmatpush.bf16.msrb.mxu1 %v2065_v12 }
  0xf5   : > { %vm679_vm2 = vmor %vm2926_vm10, %vm647_vm11  ;;  %vm327_vm10 = vcmp.eq.s32.totalorder %v2610_v34, %v2877_v63  ;;  %vm325_vm11 = vcmp.eq.s32.totalorder %v2610_v34, %v283_v29  ;;  %v2212_v63 = vld [vmem:[%s3615_s1 + $0x4c] sm:$0xf] }
  0xf6   : > { %vm2984_vm13 = vmpackc.low %vm679_vm2, %vm677_vm9  ;;  %v1953_v5 = vor.u32 %v2212_v63, %v1950_v0 }
  0xf7   : > { %v3703_v36 = vsel %vm2984_vm13, 4294967295, %v3702_v36  ;;  %2115 = vmatmul.msk.bf16.gmra.mxu2 %vm2984_vm13, %v2380_v58  ;;  %vm680_vm6 = vmor %vm2970_vm1, %vm648_vm7 }
  0xf8   : > { %vm2999_vm0 = vmpackc.low %vm680_vm6, %vm678_vm8  ;;  %vm326_vm8 = vcmp.eq.s32.totalorder %v2617_v40, %v283_v29  ;;  %vm517_vm6 = vcmp.eq.s32.totalorder %v2610_v34, %v475_v33  ;;  %1187 = vmatpush.bf16.msrb.mxu2 %v1953_v5  ;;  %v2052_v29 = vld [vmem:[%s3615_s1 + $0x110] sm:$0xf]  ;;  %v1945_v5 = vor.u32 %v2211_v3, %v1944_v2 }
  0xf9   : > { %v3705_v39 = vsel %vm2999_vm0, 4294967295, %v3704_v39  ;;  %2131 = vmatmul.msk.bf16.gmra.mxu3 %vm2999_vm0, %v2380_v58  ;;  %v2053_v35 = vor.u32 %v2238_v30, %v2052_v29  ;;  %v508_v55 = vpop.permute.xlu2 %507  ;;  %v2016_v29 = vld [vmem:[%s3615_s1 + $0xc8] sm:$0xf]  ;;  %v2229_v30 = vld [vmem:[%s3615_s1 + $0xd0] sm:$0xf0] }
  0xfa   : > { %v366_v49 = vpop.permute.xlu1 %365  ;;  %vm539_vm14 = vcmp.eq.s32.totalorder %v2610_v34, %v508_v55  ;;  %1286 = vmatpush.bf16.msrb.mxu0 %v1945_v5 }
  0xfb   : > { %vm407_vm15 = vcmp.eq.s32.totalorder %v2610_v34, %v366_v49  ;;  %vm408_vm12 = vcmp.eq.s32.totalorder %v2617_v40, %v366_v49  ;;  %v363_v53 = vpop.permute.xlu0 %362  ;;  %1334 = vmatpush.bf16.msrb.mxu1 %v2053_v35  ;;  %v1914_v49 = vld [vmem:[%s3615_s1 + $0xc] sm:$0xf0] }
  0xfc   : > { %vm3030_vm1 = vmor %vm327_vm10, %vm407_vm15  ;;  %vm405_vm4 = vcmp.eq.s32.totalorder %v2610_v34, %v363_v53  ;;  %vm406_vm9 = vcmp.eq.s32.totalorder %v2617_v40, %v363_v53  ;;  %vm518_vm15 = vcmp.eq.s32.totalorder %v2617_v40, %v475_v33  ;;  %1188 = vmatpush.bf16.msrb.mxu2 %v1941_v18  ;;  %v1917_v51 = vor.u32 %v2203_v48, %v1914_v49  ;;  %v2010_v53 = vld [vmem:[%s3615_s1 + $0xcc] sm:$0xf0] }
  0xfd   : > { %vm3037_vm7 = vmor %vm328_vm5, %vm408_vm12  ;;  %v2013_v54 = vor.u32 %v2227_v52, %v2010_v53 }
  0xfe   : > { %vm437_vm2 = vmor %vm325_vm11, %vm405_vm4  ;;  %1287 = vmatpush.bf16.msrb.mxu0 %v1933_v14 }
  0xff   : > { %vm438_vm10 = vmor %vm326_vm8, %vm406_vm9  ;;  %1239 = vmatpush.bf16.msrb.mxu3 %v2013_v54 }
 0x100   : > { %vm3044_vm0 = vmor %vm437_vm2, %vm517_vm6  ;;  %vm632_vm6 = vcmp.eq.s32.totalorder %v2617_v40, %v590_v57  ;;  %1189 = vmatpush.bf16.msrb.mxu2 %v1929_v46 }
 0x101   : > { %vm3048_vm13 = vmor %vm438_vm10, %vm518_vm15  ;;  %v289_v0 = vpop.permute.xlu2 %288 }
 0x102   : > { %v587_v1 = vpop.permute.xlu1 %586  ;;  %1288 = vmatpush.bf16.msrb.mxu0 %v1921_v27 }
 0x103   : > { %vm629_vm12 = vcmp.eq.s32.totalorder %v2610_v34, %v587_v1  ;;  %v478_v6 = vpop.permute.xlu0 %477  ;;  %vm630_vm8 = vcmp.eq.s32.totalorder %v2617_v40, %v587_v1 }
 0x104   : > { %vm519_vm5 = vcmp.eq.s32.totalorder %v2610_v34, %v478_v6  ;;  %vm520_vm4 = vcmp.eq.s32.totalorder %v2617_v40, %v478_v6  ;;  %vm3081_vm9 = vmor %vm3044_vm0, %vm629_vm12  ;;  %vm631_vm0 = vcmp.eq.s32.totalorder %v2610_v34, %v590_v57  ;;  %1190 = vmatpush.bf16.msrb.mxu2 %v1917_v51  ;;  %v2040_v6 = vld [vmem:[%s3615_s1 + $0xf8] sm:$0xf] }
 0x105   : > { %vm551_vm11 = vmor %vm3030_vm1, %vm519_vm5  ;;  %v2041_v8 = vor.u32 %v2235_v7, %v2040_v6 }
 0x106   : > { %vm3097_vm2 = vmor %vm3037_vm7, %vm520_vm4  ;;  %vm425_vm4 = vcmp.eq.s32.totalorder %v2610_v34, %v393_v21 }
 0x107   : > { %vm663_vm1 = vmor %vm551_vm11, %vm631_vm0  ;;  %vm426_vm11 = vcmp.eq.s32.totalorder %v2617_v40, %v393_v21  ;;  %1335 = vmatpush.bf16.msrb.mxu1 %v2041_v8 }
 0x108   : > { %vm3109_vm7 = vmpackc.low %vm663_vm1, %vm3081_vm9 }
 0x109   : > { %v3719_v23 = vsel %vm3109_vm7, 4294967295, %v3718_v23  ;;  %2107 = vmatmul.msk.bf16.gmra.mxu0 %vm3109_vm7, %v2380_v58  ;;  %vm662_vm10 = vmor %vm3048_vm13, %vm630_vm8  ;;  %v372_v21 = vpop.permute.xlu2 %371 }
 0x10a   : > { %vm664_vm15 = vmor %vm3097_vm2, %vm632_vm6  ;;  %v316_v33 = vpop.permute.xlu1 %315 }
 0x10b   : > { %vm3141_vm13 = vmpackc.low %vm664_vm15, %vm662_vm10  ;;  %v313_v42 = vpop.permute.xlu0 %312  ;;  %vm347_vm6 = vcmp.eq.s32.totalorder %v2610_v34, %v316_v33  ;;  %1336 = vmatpush.bf16.msrb.mxu1 %v2029_v20 }
 0x10c   : > { %v3721_v41 = vsel %vm3141_vm13, 4294967295, %v3720_v41  ;;  %2123 = vmatmul.msk.bf16.gmra.mxu1 %vm3141_vm13, %v2380_v58  ;;  %vm345_vm12 = vcmp.eq.s32.totalorder %v2610_v34, %v313_v42  ;;  %vm346_vm5 = vcmp.eq.s32.totalorder %v2617_v40, %v313_v42  ;;  %vm348_vm13 = vcmp.eq.s32.totalorder %v2617_v40, %v316_v33 }
 0x10d   : > { %vm457_vm0 = vmor %vm345_vm12, %vm425_vm4  ;;  %v2017_v33 = vor.u32 %v2229_v30, %v2016_v29 }
 0x10e   : > { %vm458_vm2 = vmor %vm346_vm5, %vm426_vm11  ;;  %vm540_vm5 = vcmp.eq.s32.totalorder %v2617_v40, %v508_v55 }
 0x10f   : > { %1337 = vmatpush.bf16.msrb.mxu1 %v2017_v33 }
 0x111   : > { %v593_v49 = vpop.permute.xlu2 %592 }
 0x112   : > { %v505_v57 = vpop.permute.xlu1 %504 }
 0x113   : > { %vm537_vm9 = vcmp.eq.s32.totalorder %v2610_v34, %v505_v57  ;;  %v396_v60 = vpop.permute.xlu0 %395  ;;  %vm538_vm10 = vcmp.eq.s32.totalorder %v2617_v40, %v505_v57 }
 0x114   : > { %vm427_vm8 = vcmp.eq.s32.totalorder %v2610_v34, %v396_v60  ;;  %vm428_vm1 = vcmp.eq.s32.totalorder %v2617_v40, %v396_v60  ;;  %vm3175_vm15 = vmor %vm457_vm0, %vm537_vm9 }
 0x115   : > { %vm459_vm7 = vmor %vm347_vm6, %vm427_vm8 }
 0x116   : > { %vm460_vm3 = vmor %vm348_vm13, %vm428_vm1 }
 0x117   : > { %vm3181_vm12 = vmor %vm458_vm2, %vm538_vm10 }
 0x118   : > { %vm571_vm4 = vmor %vm459_vm7, %vm539_vm14 }
 0x119   : > { %vm572_vm11 = vmor %vm460_vm3, %vm540_vm5 }
 0x11a   : > { %v620_v63 = vpop.permute.xlu1 %619 }
 0x11b   : > { %vm651_vm9 = vcmp.eq.s32.totalorder %v2610_v34, %v620_v63  ;;  %v617_v1 = vpop.permute.xlu0 %616  ;;  %vm652_vm1 = vcmp.eq.s32.totalorder %v2617_v40, %v620_v63 }
 0x11c   : > { %vm649_vm0 = vcmp.eq.s32.totalorder %v2610_v34, %v617_v1  ;;  %vm650_vm8 = vcmp.eq.s32.totalorder %v2617_v40, %v617_v1  ;;  %vm683_vm13 = vmor %vm571_vm4, %vm651_vm9  ;;  %vm330_vm4 = vcmp.eq.s32.totalorder %v2617_v40, %v289_v0 }
 0x11d   : > { %vm681_vm2 = vmor %vm3175_vm15, %vm649_vm0  ;;  %vm411_vm0 = vcmp.eq.s32.totalorder %v2610_v34, %v372_v21 }
 0x11e   : > { %vm3198_vm14 = vmpackc.low %vm683_vm13, %vm681_vm2 }
 0x11f   : > { %v3727_v4 = vsel %vm3198_vm14, 4294967295, %v3726_v4  ;;  %2117 = vmatmul.msk.bf16.gmra.mxu2 %vm3198_vm14, %v2380_v58  ;;  %vm682_vm3 = vmor %vm3181_vm12, %vm650_vm8  ;;  %vm329_vm12 = vcmp.eq.s32.totalorder %v2610_v34, %v289_v0 }
 0x120   : > { %vm684_vm7 = vmor %vm572_vm11, %vm652_vm1  ;;  %vm412_vm1 = vcmp.eq.s32.totalorder %v2617_v40, %v372_v21 }
 0x121   : > { %vm3213_vm6 = vmpackc.low %vm684_vm7, %vm682_vm3 }
 0x122   : > { %v3729_v9 = vsel %vm3213_vm6, 4294967295, %v3728_v9  ;;  %2133 = vmatmul.msk.bf16.gmra.mxu3 %vm3213_vm6, %v2380_v58  ;;  %v1114_v12 = vpop.f32.mrf.mxu2  ;;  %v369_v13 = vpop.permute.xlu1 %368 }
 0x123   : > { %v292_v18 = vpop.permute.xlu0 %291  ;;  %vm409_vm10 = vcmp.eq.s32.totalorder %v2610_v34, %v369_v13  ;;  %vm410_vm15 = vcmp.eq.s32.totalorder %v2617_v40, %v369_v13 }
 0x124   : > { %vm331_vm5 = vcmp.eq.s32.totalorder %v2610_v34, %v292_v18  ;;  %vm3249_vm9 = vmor %vm329_vm12, %vm409_vm10  ;;  %vm332_vm11 = vcmp.eq.s32.totalorder %v2617_v40, %v292_v18 }
 0x125   : > { %v1163_v22 = vpop.f32.mrf.mxu3  ;;  %vm3255_vm8 = vmor %vm330_vm4, %vm410_vm15  ;;  %vm3736_vm4 = vnez %v3668_v16 }
 0x126   : > { %v1164_v26 = vadd.f32 %v1163_v22, %v1114_v12  ;;  %vm443_vm2 = vmor %vm331_vm5, %vm411_vm0  ;;  %vm633_vm0 = vcmp.eq.s32.totalorder %v2610_v34, %v593_v49 }
 0x127   : > { %vm444_vm7 = vmor %vm332_vm11, %vm412_vm1  ;;  %vm3737_vm1 = vnez %v3670_v19 }
 0x128   : > { %v1409_v52 = vadd.f32 %v3264_v45, %v1164_v26 }
 0x12a   : > { %v484_v35 = vpop.permute.xlu1 %483  ;;  %v1116_v38 = vpop.f32.mrf.mxu2 }
 0x12b   : > { %v481_v42 = vpop.permute.xlu0 %480  ;;  %vm523_vm13 = vcmp.eq.s32.totalorder %v2610_v34, %v484_v35  ;;  %vm524_vm15 = vcmp.eq.s32.totalorder %v2617_v40, %v484_v35 }
 0x12c   : > { %vm521_vm3 = vcmp.eq.s32.totalorder %v2610_v34, %v481_v42  ;;  %vm522_vm10 = vcmp.eq.s32.totalorder %v2617_v40, %v481_v42  ;;  %vm3276_vm12 = vmor %vm443_vm2, %vm523_vm13  ;;  %vm634_vm2 = vcmp.eq.s32.totalorder %v2617_v40, %v593_v49 }
 0x12d   : > { %v1165_v46 = vpop.f32.mrf.mxu3  ;;  %vm553_vm5 = vmor %vm3249_vm9, %vm521_vm3 }
 0x12e   : > { %v1166_v48 = vadd.f32 %v1165_v46, %v1116_v38  ;;  %vm554_vm11 = vmor %vm3255_vm8, %vm522_vm10 }
 0x12f   : > { %2135 = vmatmul.msk.bf16.vlgmr.msrb.gmra.mxu2 %vm3736_vm4, %v2380_v58  ;;  %vm556_vm13 = vmor %vm444_vm7, %vm524_vm15  ;;  %vm3744_vm15 = vnez %v3668_v16 }
 0x130   : > { %v1412_v53 = vadd.f32 %v3269_v47, %v1166_v48  ;;  %vm665_vm6 = vmor %vm553_vm5, %vm633_vm0  ;;  %vm1682_vm5 = vcmask 1041409   ;;  %vm3748_vm0 = vnez %v3658_v59 }
 0x131   : > { %vm666_vm9 = vmor %vm554_vm11, %vm634_vm2  ;;  %vm3747_vm11 = vnez %v3656_v56  ;;  %vm3751_vm2 = vnez %v3703_v36 }
 0x132   : > { %v1517_v54 = vmax.f32 %v1409_v52, %v1412_v53  ;;  %2151 = vmatmul.msk.bf16.vlgmr.msrb.gmra.mxu3 %vm3737_vm1, %v2380_v58 }
 0x133   : > { %v596_v55 = vpop.permute.xlu0 %595 }
 0x134   : > { %vm635_vm14 = vcmp.eq.s32.totalorder %v2610_v34, %v596_v55  ;;  %vm636_vm4 = vcmp.eq.s32.totalorder %v2617_v40, %v596_v55  ;;  %v1094_v57 = vpop.f32.mrf.mxu0  ;;  %v1518_v8 = vrot.slane %v1517_v54, 4 }
 0x135   : > { %vm667_vm8 = vmor %vm3276_vm12, %vm635_vm14  ;;  %vm3742_vm14 = vnez %v3685_v43  ;;  %vm3745_vm12 = vnez %v3719_v23 }
 0x136   : > { %vm668_vm3 = vmor %vm556_vm13, %vm636_vm4  ;;  %v1143_v60 = vpop.f32.mrf.mxu1  ;;  %vm3746_vm4 = vnez %v3721_v41  ;;  %v1519_v10 = vmax.f32 %v1517_v54, %v1518_v8  ;;  %vm3749_vm13 = vnez %v3676_v28 }
 0x137   : > { %v1144_v61 = vadd.f32 %v1143_v60, %v1094_v57  ;;  %vm3298_vm7 = vmpackc.low %vm667_vm8, %vm665_vm6  ;;  %vm3743_vm6 = vnez %v3687_v50  ;;  %v3346_v50 = vld [vmem:[%s3616_s2] sm:$0x7]  ;;  %vm1685_vm8 = vcmask 1042434  }
 0x138   : > { %2109 = vmatmul.msk.bf16.gmra.mxu0 %vm3298_vm7, %v2380_v58  ;;  %vm3305_vm10 = vmpackc.low %vm668_vm3, %vm666_vm9  ;;  %v1520_v19 = vrot.slane %v1519_v10, 2  ;;  %v3352_v30 = vperm.slane %v3346_v50, 0  ;;  %vm3752_vm9 = vnez %v3705_v39  ;;  %vm3753_vm3 = vnez %v3727_v4 }
 0x139   : > { %2125 = vmatmul.msk.bf16.gmra.mxu1 %vm3305_vm10, %v2380_v58  ;;  %v1385_v1 = vadd.f32 %v3264_v45, %v1144_v61 }
 0x13a   : > { %v1521_v18 = vmax.f32 %v1519_v10, %v1520_v19 }
 0x13c   : > { %v1096_v40 = vpop.f32.mrf.mxu0  ;;  %v1522_v24 = vrot.slane %v1521_v18, 1 }
 0x13e   : > { %v1145_v63 = vpop.f32.mrf.mxu1  ;;  %v1523_v29 = vmax.f32 %v1521_v18, %v1522_v24 }
 0x13f   : > { %v1146_v0 = vadd.f32 %v1145_v63, %v1096_v40  ;;  %2137 = vmatmul.msk.bf16.gmra.mxu2 %vm3742_vm14, %v2380_v58 }
 0x140   : > { %v1621_v46 = vadd.f32 %v3352_v30, %v1523_v29 }
 0x141   : > { %v1388_v2 = vadd.f32 %v3269_v47, %v1146_v0 }
 0x142   : > { %2153 = vmatmul.msk.bf16.gmra.mxu3 %vm3743_vm6, %v2380_v58  ;;  %v1645_v55 = vmax.f32 %v1621_v46, 0.0 }
 0x143   : > { %v1433_v3 = vmax.f32 %v1385_v1, %v1388_v2 }
 0x145   : > { %v1434_v25 = vrot.slane %v1433_v3, 4 }
 0x147   : > { %v1435_v35 = vmax.f32 %v1433_v3, %v1434_v25 }
 0x148   : > { %2167 = vmatmul.msk.bf16.vlgmr.msrb.gmra.mxu0 %vm3744_vm15, %v2380_v58  ;;  %vm1781_vm15 = vcmask 1041408  }
 0x149   : > { %2183 = vmatmul.msk.bf16.vlgmr.msrb.gmra.mxu1 %vm3737_vm1, %v2380_v58  ;;  %v1436_v48 = vrot.slane %v1435_v35, 2  ;;  %vm3750_vm1 = vnez %v3678_v31 }
 0x14b   : > { %v1437_v57 = vmax.f32 %v1435_v35, %v1436_v48 }
 0x14c   : > { %v1119_v5 = vpop.f32.mrf.mxu2 }
 0x14d   : > { %v1438_v40 = vrot.slane %v1437_v57, 1 }
 0x14f   : > { %v1168_v6 = vpop.f32.mrf.mxu3  ;;  %2139 = vmatmul.msk.bf16.gmra.mxu2 %vm3745_vm12, %v2380_v58  ;;  %v1439_v1 = vmax.f32 %v1437_v57, %v1438_v40 }
 0x150   : > { %v1169_v7 = vadd.f32 %v1168_v6, %v1119_v5 }
 0x151   : > { %v1609_v5 = vadd.f32 %v3352_v30, %v1439_v1 }
 0x152   : > { %2155 = vmatmul.msk.bf16.gmra.mxu3 %vm3746_vm4, %v2380_v58  ;;  %v1415_v13 = vadd.f32 %v3264_v45, %v1169_v7 }
 0x154   : > { %v1121_v11 = vpop.f32.mrf.mxu2 }
 0x157   : > { %v1170_v16 = vpop.f32.mrf.mxu3 }
 0x158   : > { %v1171_v12 = vadd.f32 %v1170_v16, %v1121_v11  ;;  %2169 = vmatmul.msk.bf16.gmra.mxu0 %vm3742_vm14, %v2380_v58  ;;  %v1633_v16 = vmax.f32 %v1609_v5, 0.0  ;;  %vm1726_vm14 = vcmask 1043456  }
 0x159   : > { %2185 = vmatmul.msk.bf16.gmra.mxu1 %vm3743_vm6, %v2380_v58  ;;  %vm1779_vm6 = vcmask 1040384  }
 0x15a   : > { %v1418_v14 = vadd.f32 %v3269_v47, %v1171_v12 }
 0x15c   : > { %v1538_v15 = vmax.f32 %v1415_v13, %v1418_v14  ;;  %v1099_v17 = vpop.f32.mrf.mxu0 }
 0x15e   : > { %v1539_v20 = vrot.slane %v1538_v15, 4 }
 0x15f   : > { %v1148_v21 = vpop.f32.mrf.mxu1  ;;  %2141 = vmatmul.msk.bf16.gmra.mxu2 %vm3298_vm7, %v2380_v58 }
 0x160   : > { %v1540_v43 = vmax.f32 %v1538_v15, %v1539_v20  ;;  %v1149_v22 = vadd.f32 %v1148_v21, %v1099_v17 }
 0x162   : > { %v1541_v26 = vrot.slane %v1540_v43, 2  ;;  %2157 = vmatmul.msk.bf16.gmra.mxu3 %vm3305_vm10, %v2380_v58  ;;  %v1391_v51 = vadd.f32 %v3264_v45, %v1149_v22 }
 0x164   : > { %v1542_v27 = vmax.f32 %v1540_v43, %v1541_v26  ;;  %v1101_v33 = vpop.f32.mrf.mxu0 }
 0x166   : > { %v1543_v37 = vrot.slane %v1542_v27, 1 }
 0x167   : > { %v1150_v38 = vpop.f32.mrf.mxu1 }
 0x168   : > { %v1544_v42 = vmax.f32 %v1542_v27, %v1543_v37  ;;  %v1151_v44 = vadd.f32 %v1150_v38, %v1101_v33  ;;  %2171 = vmatmul.msk.bf16.gmra.mxu0 %vm3745_vm12, %v2380_v58  ;;  %vm3532_vm12 = vcmp.lt.s32.totalorder %v266_v32, 384 }
 0x169   : > { %2187 = vmatmul.msk.bf16.gmra.mxu1 %vm3746_vm4, %v2380_v58 }
 0x16a   : > { %v1624_v49 = vadd.f32 %v3352_v30, %v1544_v42  ;;  %v1394_v52 = vadd.f32 %v3269_v47, %v1151_v44 }
 0x16c   : > { %v1648_v53 = vmax.f32 %v1624_v49, 0.0  ;;  %v1454_v54 = vmax.f32 %v1391_v51, %v1394_v52 }
 0x16e   : > { %v1702_v23 = vrot.slane %v1648_v53, 7  ;;  %v1455_v60 = vrot.slane %v1454_v54, 4 }
 0x16f   : > { %2143 = vmatmul.msk.bf16.gmra.mxu2 %vm3747_vm11, %v2380_v58 }
 0x170   : > { %v1703_v41 = vsel %vm1682_vm5, %v1702_v23, %v1645_v55  ;;  %v1456_v61 = vmax.f32 %v1454_v54, %v1455_v60 }
 0x172   : > { %v1457_v63 = vrot.slane %v1456_v61, 2  ;;  %2159 = vmatmul.msk.bf16.gmra.mxu3 %vm3748_vm0, %v2380_v58 }
 0x174   : > { %v1458_v0 = vmax.f32 %v1456_v61, %v1457_v63 }
 0x176   : > { %v1459_v2 = vrot.slane %v1458_v0, 1 }
 0x178   : > { %v1460_v3 = vmax.f32 %v1458_v0, %v1459_v2  ;;  %2173 = vmatmul.msk.bf16.gmra.mxu0 %vm3298_vm7, %v2380_v58  ;;  %vm3754_vm7 = vnez %v3729_v9 }
 0x179   : > { %2189 = vmatmul.msk.bf16.gmra.mxu1 %vm3305_vm10, %v2380_v58  ;;  %vm1688_vm10 = vcmask 1043459  }
 0x17a   : > { %v1612_v6 = vadd.f32 %v3352_v30, %v1460_v3  ;;  %v1124_v7 = vpop.f32.mrf.mxu2 }
 0x17c   : > { %v1636_v8 = vmax.f32 %v1612_v6, 0.0  ;;  %v1173_v10 = vpop.f32.mrf.mxu3 }
 0x17d   : > { %v1174_v11 = vadd.f32 %v1173_v10, %v1124_v7 }
 0x17e   : > { %v1681_v12 = vrot.slane %v1636_v8, 7 }
 0x17f   : > { %2145 = vmatmul.msk.bf16.gmra.mxu2 %vm3749_vm13, %v2380_v58  ;;  %v1421_v15 = vadd.f32 %v3264_v45, %v1174_v11 }
 0x180   : > { %v1683_v62 = vsel %vm1682_vm5, %v1681_v12, %v1633_v16 }
 0x182   : > { %2161 = vmatmul.msk.bf16.gmra.mxu3 %vm3750_vm1, %v2380_v58  ;;  %v1126_v34 = vpop.f32.mrf.mxu2 }
 0x184   : > { %v1175_v19 = vpop.f32.mrf.mxu3 }
 0x185   : > { %v1176_v13 = vadd.f32 %v1175_v19, %v1126_v34 }
 0x186   : > { %v1104_v14 = vpop.f32.mrf.mxu0 }
 0x187   : > { %v1424_v17 = vadd.f32 %v3269_v47, %v1176_v13 }
 0x188   : > { %2175 = vmatmul.msk.bf16.gmra.mxu0 %vm3747_vm11, %v2380_v58 }
 0x189   : > { %v1559_v18 = vmax.f32 %v1421_v15, %v1424_v17  ;;  %v1153_v20 = vpop.f32.mrf.mxu1  ;;  %2191 = vmatmul.msk.bf16.gmra.mxu1 %vm3748_vm0, %v2380_v58 }
 0x18a   : > { %v1154_v21 = vadd.f32 %v1153_v20, %v1104_v14 }
 0x18b   : > { %v1560_v43 = vrot.slane %v1559_v18, 4 }
 0x18c   : > { %v1397_v59 = vadd.f32 %v3264_v45, %v1154_v21 }
 0x18d   : > { %v1561_v22 = vmax.f32 %v1559_v18, %v1560_v43 }
 0x18e   : > { %v1106_v25 = vpop.f32.mrf.mxu0 }
 0x18f   : > { %v1562_v24 = vrot.slane %v1561_v22, 2  ;;  %2147 = vmatmul.msk.bf16.gmra.mxu2 %vm3751_vm2, %v2380_v58 }
 0x191   : > { %v1563_v26 = vmax.f32 %v1561_v22, %v1562_v24  ;;  %v1155_v27 = vpop.f32.mrf.mxu1 }
 0x192   : > { %v1156_v29 = vadd.f32 %v1155_v27, %v1106_v25  ;;  %2163 = vmatmul.msk.bf16.gmra.mxu3 %vm3752_vm9, %v2380_v58 }
 0x193   : > { %v1564_v56 = vrot.slane %v1563_v26, 1 }
 0x194   : > { %v1400_v33 = vadd.f32 %v3269_v47, %v1156_v29 }
 0x195   : > { %v1565_v35 = vmax.f32 %v1563_v26, %v1564_v56 }
 0x196   : > { %v1475_v37 = vmax.f32 %v1397_v59, %v1400_v33 }
 0x197   : > { %v1627_v38 = vadd.f32 %v3352_v30, %v1565_v35 }
 0x198   : > { %v1476_v42 = vrot.slane %v1475_v37, 4  ;;  %2177 = vmatmul.msk.bf16.gmra.mxu0 %vm3749_vm13, %v2380_v58 }
 0x199   : > { %v1651_v44 = vmax.f32 %v1627_v38, 0.0  ;;  %2193 = vmatmul.msk.bf16.gmra.mxu1 %vm3750_vm1, %v2380_v58 }
 0x19a   : > { %v1477_v46 = vmax.f32 %v1475_v37, %v1476_v42 }
 0x19b   : > { %v1704_v48 = vrot.slane %v1651_v44, 6 }
 0x19c   : > { %v1478_v49 = vrot.slane %v1477_v46, 2 }
 0x19d   : > { %v1705_v51 = vsel %vm1685_vm8, %v1704_v48, %v1703_v41 }
 0x19e   : > { %v1479_v52 = vmax.f32 %v1477_v46, %v1478_v49 }
 0x19f   : > { %2149 = vmatmul.msk.bf16.gmra.mxu2 %vm3753_vm3, %v2380_v58 }
 0x1a0   : > { %v1480_v53 = vrot.slane %v1479_v52, 1 }
 0x1a2   : > { %v1481_v54 = vmax.f32 %v1479_v52, %v1480_v53  ;;  %2165 = vmatmul.msk.bf16.gmra.mxu3 %vm3754_vm7, %v2380_v58  ;;  %v1129_v28 = vpop.f32.mrf.mxu2  ;;  %v3442_v53 = vld [vmem:[%s3617_s3 + $0x20] sm:$0xff] }
 0x1a4   : > { %v1615_v31 = vadd.f32 %v3352_v30, %v1481_v54 }
 0x1a5   : > { %v1178_v55 = vpop.f32.mrf.mxu3 }
 0x1a6   : > { %v1639_v57 = vmax.f32 %v1615_v31, 0.0  ;;  %v1179_v23 = vadd.f32 %v1178_v55, %v1129_v28 }
 0x1a8   : > { %v1684_v60 = vrot.slane %v1639_v57, 6  ;;  %2179 = vmatmul.msk.bf16.gmra.mxu0 %vm3751_vm2, %v2380_v58  ;;  %v1427_v0 = vadd.f32 %v3264_v45, %v1179_v23 }
 0x1a9   : > { %2195 = vmatmul.msk.bf16.gmra.mxu1 %vm3752_vm9, %v2380_v58 }
 0x1aa   : > { %v1686_v41 = vsel %vm1685_vm8, %v1684_v60, %v1683_v62  ;;  %v1131_v61 = vpop.f32.mrf.mxu2 }
 0x1ad   : > { %v1180_v40 = vpop.f32.mrf.mxu3 }
 0x1ae   : > { %v1181_v63 = vadd.f32 %v1180_v40, %v1131_v61 }
 0x1b0   : > { %v1430_v1 = vadd.f32 %v3269_v47, %v1181_v63 }
 0x1b2   : > { %v1580_v2 = vmax.f32 %v1427_v0, %v1430_v1  ;;  %v1192_v3 = vpop.f32.mrf.mxu2 }
 0x1b4   : > { %v1581_v5 = vrot.slane %v1580_v2, 4 }
 0x1b5   : > { %v1241_v6 = vpop.f32.mrf.mxu3  ;;  %v1109_v7 = vpop.f32.mrf.mxu0 }
 0x1b6   : > { %v1582_v36 = vmax.f32 %v1580_v2, %v1581_v5  ;;  %v1158_v8 = vpop.f32.mrf.mxu1  ;;  %v1242_v23 = vadd.f32 %v1241_v6, %v1192_v3 }
 0x1b7   : > { %v1159_v10 = vadd.f32 %v1158_v8, %v1109_v7 }
 0x1b8   : > { %v1583_v11 = vrot.slane %v1582_v36, 2  ;;  %2181 = vmatmul.msk.bf16.gmra.mxu0 %vm3753_vm3, %v2380_v58 }
 0x1b9   : > { %2197 = vmatmul.msk.bf16.gmra.mxu1 %vm3754_vm7, %v2380_v58  ;;  %v1403_v17 = vadd.f32 %v3264_v45, %v1159_v10 }
 0x1ba   : > { %v1584_v39 = vmax.f32 %v1582_v36, %v1583_v11  ;;  %v1194_v16 = vpop.f32.mrf.mxu2 }
 0x1bc   : > { %v1585_v12 = vrot.slane %v1584_v39, 1 }
 0x1bd   : > { %v1243_v62 = vpop.f32.mrf.mxu3  ;;  %v1111_v34 = vpop.f32.mrf.mxu0 }
 0x1be   : > { %v1586_v19 = vmax.f32 %v1584_v39, %v1585_v12  ;;  %v1160_v13 = vpop.f32.mrf.mxu1  ;;  %v1244_v31 = vadd.f32 %v1243_v62, %v1194_v16 }
 0x1bf   : > { %v1161_v14 = vadd.f32 %v1160_v13, %v1111_v34 }
 0x1c0   : > { %v1630_v15 = vadd.f32 %v3352_v30, %v1586_v19  ;;  %v1389_v0 = vadd.f32 %v3442_v53, %v1244_v31 }
 0x1c1   : > { %v1406_v18 = vadd.f32 %v3269_v47, %v1161_v14 }
 0x1c2   : > { %v1654_v4 = vmax.f32 %v1630_v15, 0.0  ;;  %v1197_v20 = vpop.f32.mrf.mxu2  ;;  %v3461_v15 = vld [vmem:[%s3617_s3 + $0x28] sm:$0xff] }
 0x1c3   : > { %v1496_v21 = vmax.f32 %v1403_v17, %v1406_v18 }
 0x1c4   : > { %v1706_v9 = vrot.slane %v1654_v4, 5 }
 0x1c5   : > { %v1497_v58 = vrot.slane %v1496_v21, 4  ;;  %v1246_v43 = vpop.f32.mrf.mxu3  ;;  %v1290_v22 = vpop.f32.mrf.mxu0 }
 0x1c6   : > { %v3436_v24 = vsel %vm1688_vm10, %v1706_v9, %v1705_v51  ;;  %v1339_v25 = vpop.f32.mrf.mxu1  ;;  %v1247_v51 = vadd.f32 %v1246_v43, %v1197_v20  ;;  %v3467_v20 = vld [vmem:[%s3617_s3 + $0x10] sm:$0xff] }
 0x1c7   : > { %v1498_v26 = vmax.f32 %v1496_v21, %v1497_v58  ;;  %v1340_v43 = vadd.f32 %v1339_v25, %v1290_v22 }
 0x1c9   : > { %v1499_v27 = vrot.slane %v1498_v26, 2 }
 0x1ca   : > { %v1199_v29 = vpop.f32.mrf.mxu2 }
 0x1cb   : > { %v1500_v56 = vmax.f32 %v1498_v26, %v1499_v27 }
 0x1cd   : > { %v1501_v59 = vrot.slane %v1500_v56, 1  ;;  %v1248_v45 = vpop.f32.mrf.mxu3  ;;  %v1292_v33 = vpop.f32.mrf.mxu0 }
 0x1ce   : > { %v1341_v47 = vpop.f32.mrf.mxu1  ;;  %v1249_v44 = vadd.f32 %v1248_v45, %v1199_v29 }
 0x1cf   : > { %v1502_v35 = vmax.f32 %v1500_v56, %v1501_v59  ;;  %v1342_v9 = vadd.f32 %v1341_v47, %v1292_v33 }
 0x1d0   : > { %v1395_v28 = vadd.f32 %v3442_v53, %v1249_v44 }
 0x1d1   : > { %v1618_v37 = vadd.f32 %v3352_v30, %v1502_v35  ;;  %v3451_v30 = vld [vmem:[%s3617_s3 + $0x8] sm:$0xff]  ;;  %v1390_v44 = vadd.f32 %v3461_v15, %v1342_v9 }
 0x1d2   : > { %v1202_v38 = vpop.f32.mrf.mxu2  ;;  %v1392_v55 = vadd.f32 %v3451_v30, %v1247_v51  ;;  %v1386_v2 = vadd.f32 %v3451_v30, %v1242_v23 }
 0x1d3   : > { %v1642_v42 = vmax.f32 %v1618_v37, 0.0 }
 0x1d4   : > { %v1461_v60 = vmax.f32 %v1392_v55, %v1395_v28  ;;  %v1440_v8 = vmax.f32 %v1386_v2, %v1389_v0 }
 0x1d5   : > { %v1687_v46 = vrot.slane %v1642_v42, 5  ;;  %v1251_v48 = vpop.f32.mrf.mxu3  ;;  %v1295_v49 = vpop.f32.mrf.mxu0 }
 0x1d6   : > { %v1344_v52 = vpop.f32.mrf.mxu1  ;;  %v1252_v61 = vadd.f32 %v1251_v48, %v1202_v38  ;;  %v1462_v5 = vrot.slane %v1461_v60, 4  ;;  %v1441_v62 = vrot.slane %v1440_v8, 4  ;;  %v1387_v48 = vadd.f32 %v3467_v20, %v1340_v43 }
 0x1d7   : > { %v3445_v54 = vsel %vm1688_vm10, %v1687_v46, %v1686_v41  ;;  %v1345_v13 = vadd.f32 %v1344_v52, %v1295_v49 }
 0x1d8   : > { %v1398_v7 = vadd.f32 %v3451_v30, %v1252_v61  ;;  %v1463_v39 = vmax.f32 %v1461_v60, %v1462_v5  ;;  %v1442_v4 = vmax.f32 %v1440_v8, %v1441_v62  ;;  %v3481_v5 = vperm.slane %v3346_v50, 1 }
 0x1d9   : > { %v1393_v58 = vadd.f32 %v3467_v20, %v1345_v13 }
 0x1da   : > { %v1204_v57 = vpop.f32.mrf.mxu2  ;;  %v1464_v14 = vrot.slane %v1463_v39, 2  ;;  %v1443_v37 = vrot.slane %v1442_v4, 2 }
 0x1dc   : > { %v1465_v26 = vmax.f32 %v1463_v39, %v1464_v14  ;;  %v1444_v28 = vmax.f32 %v1442_v4, %v1443_v37 }
 0x1dd   : > { %v1253_v40 = vpop.f32.mrf.mxu3  ;;  %v1297_v63 = vpop.f32.mrf.mxu0 }
 0x1de   : > { %v1254_v41 = vadd.f32 %v1253_v40, %v1204_v57  ;;  %v1346_v1 = vpop.f32.mrf.mxu1  ;;  %v1466_v49 = vrot.slane %v1465_v26, 1  ;;  %v1447_v57 = vmax.f32 %v1387_v48, %v1390_v44  ;;  %v1445_v2 = vrot.slane %v1444_v28, 1 }
 0x1df   : > { %v1347_v6 = vadd.f32 %v1346_v1, %v1297_v63 }
 0x1e0   : > { %v1401_v36 = vadd.f32 %v3442_v53, %v1254_v41  ;;  %v1467_v60 = vmax.f32 %v1465_v26, %v1466_v49  ;;  %v1448_v8 = vrot.slane %v1447_v57, 4 }
 0x1e1   : > { %v1396_v18 = vadd.f32 %v3461_v15, %v1347_v6 }
 0x1e2   : > { %v1482_v10 = vmax.f32 %v1398_v7, %v1401_v36  ;;  %v1207_v11 = vpop.f32.mrf.mxu2 }
 0x1e3   : > { %v1468_v56 = vmax.f32 %v1393_v58, %v1396_v18 }
 0x1e4   : > { %v1483_v3 = vrot.slane %v1482_v10, 4 }
 0x1e5   : > { %v1256_v16 = vpop.f32.mrf.mxu3  ;;  %v1300_v12 = vpop.f32.mrf.mxu0  ;;  %v1469_v47 = vrot.slane %v1468_v56, 4 }
 0x1e6   : > { %v1484_v34 = vmax.f32 %v1482_v10, %v1483_v3  ;;  %v1349_v19 = vpop.f32.mrf.mxu1  ;;  %v1257_v27 = vadd.f32 %v1256_v16, %v1207_v11  ;;  %v1613_v11 = vadd.f32 %v3481_v5, %v1467_v60  ;;  %v1446_v16 = vmax.f32 %v1444_v28, %v1445_v2 }
 0x1e7   : > { %v1350_v59 = vadd.f32 %v1349_v19, %v1300_v12  ;;  %v1470_v63 = vmax.f32 %v1468_v56, %v1469_v47  ;;  %v1449_v19 = vmax.f32 %v1447_v57, %v1448_v8 }
 0x1e8   : > { %v1485_v17 = vrot.slane %v1484_v34, 2  ;;  %v1404_v33 = vadd.f32 %v3451_v30, %v1257_v27  ;;  %v1637_v13 = vmax.f32 %v1613_v11, 0.0  ;;  %v1610_v58 = vadd.f32 %v3481_v5, %v1446_v16 }
 0x1e9   : > { %v1399_v51 = vadd.f32 %v3467_v20, %v1350_v59  ;;  %v1471_v6 = vrot.slane %v1470_v63, 2 }
 0x1ea   : > { %v1209_v21 = vpop.f32.mrf.mxu2  ;;  %v1486_v29 = vmax.f32 %v1484_v34, %v1485_v17  ;;  %v1690_v59 = vrot.slane %v1637_v13, 7  ;;  %v1634_v44 = vmax.f32 %v1610_v58, 0.0 }
 0x1eb   : > { %v1472_v18 = vmax.f32 %v1470_v63, %v1471_v6  ;;  %v3501_v63 = vperm.slane %v3346_v50, 2 }
 0x1ec   : > { %v1487_v25 = vrot.slane %v1486_v29, 1 }
 0x1ed   : > { %v1258_v45 = vpop.f32.mrf.mxu3  ;;  %v1302_v35 = vpop.f32.mrf.mxu0  ;;  %v1473_v37 = vrot.slane %v1472_v18, 1 }
 0x1ee   : > { %v1259_v38 = vadd.f32 %v1258_v45, %v1209_v21  ;;  %v1351_v42 = vpop.f32.mrf.mxu1  ;;  %v1488_v40 = vmax.f32 %v1486_v29, %v1487_v25  ;;  %v1450_v29 = vrot.slane %v1449_v19, 2  ;;  %v1691_v25 = vsel %vm1682_vm5, %v1690_v59, %v1634_v44 }
 0x1ef   : > { %v1352_v46 = vadd.f32 %v1351_v42, %v1302_v35 }
 0x1f0   : > { %v1407_v22 = vadd.f32 %v3442_v53, %v1259_v38  ;;  %v1616_v3 = vadd.f32 %v3481_v5, %v1488_v40 }
 0x1f1   : > { %v1402_v52 = vadd.f32 %v3461_v15, %v1352_v46 }
 0x1f2   : > { %v1503_v31 = vmax.f32 %v1404_v33, %v1407_v22  ;;  %v3476_v55 = vpop.f32.mrf.mxu2  ;;  %v1640_v17 = vmax.f32 %v1616_v3, 0.0  ;;  %v1451_v33 = vmax.f32 %v1449_v19, %v1450_v29  ;;  %v1727_v3 = vsel %vm1726_vm14, %v3445_v54, 0.0 }
 0x1f3   : > { %v1489_v23 = vmax.f32 %v1399_v51, %v1402_v52  ;;  %v1474_v52 = vmax.f32 %v1472_v18, %v1473_v37 }
 0x1f4   : > { %v1504_v61 = vrot.slane %v1503_v31, 4  ;;  %v1692_v35 = vrot.slane %v1640_v17, 6  ;;  %v1452_v40 = vrot.slane %v1451_v33, 1 }
 0x1f5   : > { %v1490_v0 = vrot.slane %v1489_v23, 4  ;;  %v3478_v41 = vpop.f32.mrf.mxu3  ;;  %v1305_v1 = vpop.f32.mrf.mxu0  ;;  %v1614_v2 = vadd.f32 %v3501_v63, %v1474_v52 }
 0x1f6   : > { %v1505_v7 = vmax.f32 %v1503_v31, %v1504_v61  ;;  %v1354_v36 = vpop.f32.mrf.mxu1  ;;  %v1693_v51 = vsel %vm1685_vm8, %v1692_v35, %v1691_v25  ;;  %v1453_v11 = vmax.f32 %v1451_v33, %v1452_v40 }
 0x1f7   : > { %v1491_v10 = vmax.f32 %v1489_v23, %v1490_v0  ;;  %v1355_v4 = vadd.f32 %v1354_v36, %v1305_v1  ;;  %v1638_v6 = vmax.f32 %v1614_v2, 0.0 }
 0x1f8   : > { %v1506_v39 = vrot.slane %v1505_v7, 2  ;;  %v1611_v17 = vadd.f32 %v3501_v63, %v1453_v11 }
 0x1f9   : > { %v1492_v62 = vrot.slane %v1491_v10, 2  ;;  %v1405_v38 = vadd.f32 %v3467_v20, %v1355_v4  ;;  %v1696_v4 = vrot.slane %v1638_v6, 7 }
 0x1fa   : > { %v1507_v12 = vmax.f32 %v1505_v7, %v1506_v39  ;;  %v3485_v34 = vpop.f32.mrf.mxu2 }
 0x1fb   : > { %v1493_v26 = vmax.f32 %v1491_v10, %v1492_v62 }
 0x1fc   : > { %v1508_v14 = vrot.slane %v1507_v12, 1 }
 0x1fd   : > { %v3487_v21 = vpop.f32.mrf.mxu3  ;;  %v1307_v9 = vpop.f32.mrf.mxu0  ;;  %v1494_v48 = vrot.slane %v1493_v26, 1 }
 0x1fe   : > { %v1509_v43 = vmax.f32 %v1507_v12, %v1508_v14  ;;  %v1356_v27 = vpop.f32.mrf.mxu1  ;;  %v1728_v14 = vrot.slane %v1727_v3, 4 }
 0x1ff   : > { %v1357_v56 = vadd.f32 %v1356_v27, %v1307_v9  ;;  %v1495_v60 = vmax.f32 %v1493_v26, %v1494_v48  ;;  %v1635_v27 = vmax.f32 %v1611_v17, 0.0 }
 0x200   : > { %v1619_v45 = vadd.f32 %v3481_v5, %v1509_v43  ;;  %v1729_v54 = vadd.f32 %v1728_v14, %v1727_v3 }
 0x201   : > { %v1408_v42 = vadd.f32 %v3461_v15, %v1357_v56  ;;  %v1617_v8 = vadd.f32 %v3501_v63, %v1495_v60  ;;  %v1697_v59 = vsel %vm1682_vm5, %v1696_v4, %v1635_v27 }
 0x202   : > { %v1643_v46 = vmax.f32 %v1619_v45, 0.0  ;;  %v1217_v49 = vpop.f32.mrf.mxu2  ;;  %v1730_v48 = vrot.slane %v1729_v54, 2 }
 0x203   : > { %v1510_v22 = vmax.f32 %v1405_v38, %v1408_v42  ;;  %v1641_v19 = vmax.f32 %v1617_v8, 0.0 }
 0x204   : > { %v1694_v47 = vrot.slane %v1643_v46, 5  ;;  %v1731_v60 = vadd.f32 %v1730_v48, %v1729_v54 }
 0x205   : > { %v1511_v28 = vrot.slane %v1510_v22, 4  ;;  %v1266_v31 = vpop.f32.mrf.mxu3  ;;  %v3495_v57 = vpop.f32.mrf.mxu0  ;;  %v1698_v43 = vrot.slane %v1641_v19, 6 }
 0x206   : > { %v1695_v23 = vsel %vm1688_vm10, %v1694_v47, %v1693_v51  ;;  %v3498_v61 = vpop.f32.mrf.mxu1  ;;  %v1267_v44 = vadd.f32 %v1266_v31, %v1217_v49  ;;  %v1264_v51 = vadd.f32 %v3487_v21, %v3485_v34  ;;  %v1262_v49 = vadd.f32 %v3478_v41, %v3476_v55 }
 0x207   : > { %v1734_v0 = vsel %vm1726_vm14, %v1695_v23, 0.0  ;;  %v1512_v1 = vmax.f32 %v1510_v22, %v1511_v28  ;;  %v1699_v42 = vsel %vm1685_vm8, %v1698_v43, %v1697_v59  ;;  %v1732_v21 = vrot.slane %v1731_v60, 1 }
 0x208   : > { %v1735_v36 = vrot.slane %v1734_v0, 4  ;;  %v1416_v52 = vadd.f32 %v3451_v30, %v1267_v44 }
 0x209   : > { %v1513_v7 = vrot.slane %v1512_v1, 2  ;;  %v1733_v4 = vadd.f32 %v1732_v21, %v1731_v60 }
 0x20a   : > { %v1219_v10 = vpop.f32.mrf.mxu2  ;;  %v1736_v62 = vadd.f32 %v1735_v36, %v1734_v0  ;;  %v1413_v36 = vadd.f32 %v3442_v53, %v1264_v51 }
 0x20b   : > { %v1514_v39 = vmax.f32 %v1512_v1, %v1513_v7 }
 0x20c   : > { %v1737_v58 = vrot.slane %v1736_v62, 2 }
 0x20d   : > { %v1515_v16 = vrot.slane %v1514_v39, 1  ;;  %v1268_v12 = vpop.f32.mrf.mxu3  ;;  %v3508_v50 = vpop.f32.mrf.mxu0 }
 0x20e   : > { %v3510_v13 = vpop.f32.mrf.mxu1  ;;  %v1269_v56 = vadd.f32 %v1268_v12, %v1219_v10  ;;  %v1738_v38 = vadd.f32 %v1737_v58, %v1736_v62 }
 0x20f   : > { %v1516_v18 = vmax.f32 %v1514_v39, %v1515_v16  ;;  %v1410_v39 = vadd.f32 %v3451_v30, %v1262_v49  ;;  %v1362_v48 = vadd.f32 %v3510_v13, %v3508_v50 }
 0x210   : > { %v1419_v25 = vadd.f32 %v3442_v53, %v1269_v56  ;;  %v1739_v23 = vrot.slane %v1738_v38, 1 }
 0x211   : > { %v1620_v9 = vadd.f32 %v3501_v63, %v1516_v18  ;;  %v1524_v16 = vmax.f32 %v1410_v39, %v1413_v36 }
 0x212   : > { %v1222_v26 = vpop.f32.mrf.mxu2  ;;  %v1545_v31 = vmax.f32 %v1416_v52, %v1419_v25  ;;  %v1740_v34 = vadd.f32 %v1739_v23, %v1738_v38 }
 0x213   : > { %v1644_v29 = vmax.f32 %v1620_v9, 0.0  ;;  %v1525_v27 = vrot.slane %v1524_v16, 4 }
 0x214   : > { %v1546_v3 = vrot.slane %v1545_v31, 4  ;;  %v1775_v19 = vrot.slane %v1740_v34, 7 }
 0x215   : > { %v1700_v45 = vrot.slane %v1644_v29, 5  ;;  %v1271_v35 = vpop.f32.mrf.mxu3  ;;  %v1315_v37 = vpop.f32.mrf.mxu0  ;;  %v1526_v44 = vmax.f32 %v1524_v16, %v1525_v27 }
 0x216   : > { %v1364_v46 = vpop.f32.mrf.mxu1  ;;  %v1272_v0 = vadd.f32 %v1271_v35, %v1222_v26  ;;  %v1547_v17 = vmax.f32 %v1545_v31, %v1546_v3  ;;  %v1780_v59 = vsel %vm1779_vm6, %v1733_v4, %v1775_v19  ;;  %v1414_v31 = vadd.f32 %v3461_v15, %v1362_v48 }
 0x217   : > { %v1701_v33 = vsel %vm1688_vm10, %v1700_v45, %v1699_v42  ;;  %v1365_v45 = vadd.f32 %v1364_v46, %v1315_v37  ;;  %v1360_v37 = vadd.f32 %v3498_v61, %v3495_v57  ;;  %v1527_v60 = vrot.slane %v1526_v44, 2 }
 0x218   : > { %v1741_v22 = vsel %vm1726_vm14, %v1701_v33, 0.0  ;;  %v1422_v6 = vadd.f32 %v3451_v30, %v1272_v0  ;;  %v1548_v38 = vrot.slane %v1547_v17, 2 }
 0x219   : > { %v1742_v47 = vrot.slane %v1741_v22, 4  ;;  %v1417_v33 = vadd.f32 %v3467_v20, %v1365_v45  ;;  %v1411_v50 = vadd.f32 %v3467_v20, %v1360_v37 }
 0x21a   : > { %v1224_v28 = vpop.f32.mrf.mxu2  ;;  %v1549_v46 = vmax.f32 %v1547_v17, %v1548_v38 }
 0x21b   : > { %v1743_v40 = vadd.f32 %v1742_v47, %v1741_v22  ;;  %v1531_v34 = vmax.f32 %v1411_v50, %v1414_v31 }
 0x21c   : > { %v1550_v13 = vrot.slane %v1549_v46, 1 }
 0x21d   : > { %v1744_v1 = vrot.slane %v1743_v40, 2  ;;  %v1273_v2 = vpop.f32.mrf.mxu3  ;;  %v1317_v7 = vpop.f32.mrf.mxu0 }
 0x21e   : > { %v1274_v8 = vadd.f32 %v1273_v2, %v1224_v28  ;;  %v1366_v10 = vpop.f32.mrf.mxu1 }
 0x21f   : > { %v1745_v11 = vadd.f32 %v1744_v1, %v1743_v40  ;;  %v1367_v9 = vadd.f32 %v1366_v10, %v1317_v7 }
 0x220   : > { %v1425_v55 = vadd.f32 %v3442_v53, %v1274_v8  ;;  %v1528_v8 = vmax.f32 %v1526_v44, %v1527_v60 }
 0x221   : > { %v1746_v41 = vrot.slane %v1745_v11, 1  ;;  %v1420_v32 = vadd.f32 %v3461_v15, %v1367_v9 }
 0x222   : > { %v1566_v12 = vmax.f32 %v1422_v6, %v1425_v55  ;;  %v1227_v62 = vpop.f32.mrf.mxu2  ;;  %v1529_v16 = vrot.slane %v1528_v8, 1 }
 0x223   : > { %v1747_v14 = vadd.f32 %v1746_v41, %v1745_v11  ;;  %v1552_v51 = vmax.f32 %v1417_v33, %v1420_v32  ;;  %v1551_v11 = vmax.f32 %v1549_v46, %v1550_v13 }
 0x224   : > { %v1567_v18 = vrot.slane %v1566_v12, 4  ;;  %v1530_v4 = vmax.f32 %v1528_v8, %v1529_v16 }
 0x225   : > { %v1276_v58 = vpop.f32.mrf.mxu3  ;;  %v1320_v43 = vpop.f32.mrf.mxu0  ;;  %v1776_v26 = vrot.slane %v1747_v14, 6  ;;  %v1553_v2 = vrot.slane %v1552_v51, 4  ;;  %v1625_v19 = vadd.f32 %v3481_v5, %v1551_v11 }
 0x226   : > { %v1568_v29 = vmax.f32 %v1566_v12, %v1567_v18  ;;  %v1369_v56 = vpop.f32.mrf.mxu1  ;;  %v1277_v25 = vadd.f32 %v1276_v58, %v1227_v62  ;;  %v1622_v38 = vadd.f32 %v3481_v5, %v1530_v4 }
 0x227   : > { %v1782_v35 = vsel %vm1781_vm15, %v1780_v59, %v1776_v26  ;;  %v1370_v52 = vadd.f32 %v1369_v56, %v1320_v43  ;;  %v1554_v6 = vmax.f32 %v1552_v51, %v1553_v2  ;;  %v1649_v26 = vmax.f32 %v1625_v19, 0.0 }
 0x228   : > { %1791 = vst.msk [vmem:[%s3538_s13] sm:$0x7] %vm3532_vm12, %v1782_v35  ;;  %v1569_v42 = vrot.slane %v1568_v29, 2  ;;  %v1428_v1 = vadd.f32 %v3451_v30, %v1277_v25 }
 0x229   : > { %v1423_v7 = vadd.f32 %v3467_v20, %v1370_v52  ;;  %v1555_v18 = vrot.slane %v1554_v6, 2  ;;  %v1708_v37 = vrot.slane %v1649_v26, 7  ;;  %v1646_v52 = vmax.f32 %v1622_v38, 0.0 }
 0x22a   : > { %v1229_v22 = vpop.f32.mrf.mxu2  ;;  %v1570_v47 = vmax.f32 %v1568_v29, %v1569_v42  ;;  %v1748_v29 = vsel %vm1726_vm14, %v3436_v24, 0.0 }
 0x22b   : > { %v1556_v59 = vmax.f32 %v1554_v6, %v1555_v18  ;;  %v1709_v31 = vsel %vm1682_vm5, %v1708_v37, %v1646_v52 }
 0x22c   : > { %v1571_v61 = vrot.slane %v1570_v47, 1 }
 0x22d   : > { %v1278_v28 = vpop.f32.mrf.mxu3  ;;  %v1322_v23 = vpop.f32.mrf.mxu0 }
 0x22e   : > { %v1279_v40 = vadd.f32 %v1278_v28, %v1229_v22  ;;  %v1371_v49 = vpop.f32.mrf.mxu1  ;;  %v1572_v3 = vmax.f32 %v1570_v47, %v1571_v61  ;;  %v1749_v22 = vrot.slane %v1748_v29, 4  ;;  %v1557_v47 = vrot.slane %v1556_v59, 1 }
 0x22f   : > { %v1372_v0 = vadd.f32 %v1371_v49, %v1322_v23 }
 0x230   : > { %v1431_v57 = vadd.f32 %v3442_v53, %v1279_v40  ;;  %v1532_v53 = vrot.slane %v1531_v34, 4  ;;  %v1628_v17 = vadd.f32 %v3481_v5, %v1572_v3  ;;  %v1750_v49 = vadd.f32 %v1749_v22, %v1748_v29 }
 0x231   : > { %v1426_v36 = vadd.f32 %v3461_v15, %v1372_v0  ;;  %v1558_v13 = vmax.f32 %v1556_v59, %v1557_v47 }
 0x232   : > { %v1587_v10 = vmax.f32 %v1428_v1, %v1431_v57  ;;  %v1533_v43 = vmax.f32 %v1531_v34, %v1532_v53  ;;  %v1652_v56 = vmax.f32 %v1628_v17, 0.0  ;;  %v1751_v2 = vrot.slane %v1750_v49, 2 }
 0x233   : > { %v1573_v21 = vmax.f32 %v1423_v7, %v1426_v36  ;;  %v1626_v36 = vadd.f32 %v3501_v63, %v1558_v13 }
 0x234   : > { %v1588_v39 = vrot.slane %v1587_v10, 4  ;;  %v1534_v48 = vrot.slane %v1533_v43, 2  ;;  %v1710_v25 = vrot.slane %v1652_v56, 6 }
 0x235   : > { %v1574_v55 = vrot.slane %v1573_v21, 4  ;;  %v1325_v41 = vpop.f32.mrf.mxu0  ;;  %v1650_v6 = vmax.f32 %v1626_v36, 0.0 }
 0x236   : > { %v1589_v30 = vmax.f32 %v1587_v10, %v1588_v39  ;;  %v1374_v12 = vpop.f32.mrf.mxu1  ;;  %v1535_v60 = vmax.f32 %v1533_v43, %v1534_v48  ;;  %v1711_v50 = vsel %vm1685_vm8, %v1710_v25, %v1709_v31  ;;  %v1752_v39 = vadd.f32 %v1751_v2, %v1750_v49 }
 0x237   : > { %v1575_v62 = vmax.f32 %v1573_v21, %v1574_v55  ;;  %v1375_v45 = vadd.f32 %v1374_v12, %v1325_v41  ;;  %v1714_v19 = vrot.slane %v1650_v6, 7 }
 0x238   : > { %v1590_v14 = vrot.slane %v1589_v30, 2  ;;  %v1536_v61 = vrot.slane %v1535_v60, 1  ;;  %v1753_v53 = vrot.slane %v1752_v39, 1 }
 0x239   : > { %v1576_v58 = vrot.slane %v1575_v62, 2  ;;  %v1429_v51 = vadd.f32 %v3467_v20, %v1375_v45 }
 0x23a   : > { %v1591_v9 = vmax.f32 %v1589_v30, %v1590_v14  ;;  %v1537_v21 = vmax.f32 %v1535_v60, %v1536_v61 }
 0x23b   : > { %v1577_v32 = vmax.f32 %v1575_v62, %v1576_v58  ;;  %v1754_v58 = vadd.f32 %v1753_v53, %v1752_v39 }
 0x23c   : > { %v1592_v27 = vrot.slane %v1591_v9, 1  ;;  %v1623_v30 = vadd.f32 %v3501_v63, %v1537_v21 }
 0x23d   : > { %v1327_v35 = vpop.f32.mrf.mxu0  ;;  %v1578_v23 = vrot.slane %v1577_v32, 1 }
 0x23e   : > { %v1593_v42 = vmax.f32 %v1591_v9, %v1592_v27  ;;  %v1376_v44 = vpop.f32.mrf.mxu1  ;;  %v1647_v4 = vmax.f32 %v1623_v30, 0.0 }
 0x23f   : > { %v1377_v33 = vadd.f32 %v1376_v44, %v1327_v35  ;;  %v1579_v57 = vmax.f32 %v1577_v32, %v1578_v23 }
 0x240   : > { %v1631_v46 = vadd.f32 %v3481_v5, %v1593_v42  ;;  %v1715_v26 = vsel %vm1682_vm5, %v1714_v19, %v1647_v4 }
 0x241   : > { %v1432_v24 = vadd.f32 %v3461_v15, %v1377_v33  ;;  %v1629_v34 = vadd.f32 %v3501_v63, %v1579_v57 }
 0x242   : > { %v1655_v28 = vmax.f32 %v1631_v46, 0.0 }
 0x243   : > { %v1594_v40 = vmax.f32 %v1429_v51, %v1432_v24  ;;  %v1653_v16 = vmax.f32 %v1629_v34, 0.0 }
 0x244   : > { %v1712_v0 = vrot.slane %v1655_v28, 5 }
 0x245   : > { %v1595_v1 = vrot.slane %v1594_v40, 4  ;;  %v1716_v17 = vrot.slane %v1653_v16, 6 }
 0x246   : > { %v1713_v5 = vsel %vm1688_vm10, %v1712_v0, %v1711_v50 }
 0x247   : > { %v1755_v20 = vsel %vm1726_vm14, %v1713_v5, 0.0  ;;  %v1596_v15 = vmax.f32 %v1594_v40, %v1595_v1  ;;  %v1717_v29 = vsel %vm1685_vm8, %v1716_v17, %v1715_v26 }
 0x248   : > { %v1756_v7 = vrot.slane %v1755_v20, 4 }
 0x249   : > { %v1597_v8 = vrot.slane %v1596_v15, 2 }
 0x24a   : > { %v1757_v10 = vadd.f32 %v1756_v7, %v1755_v20 }
 0x24b   : > { %v1598_v11 = vmax.f32 %v1596_v15, %v1597_v8 }
 0x24c   : > { %v1758_v3 = vrot.slane %v1757_v10, 2 }
 0x24d   : > { %v1599_v55 = vrot.slane %v1598_v11, 1 }
 0x24e   : > { %v1759_v41 = vadd.f32 %v1758_v3, %v1757_v10 }
 0x24f   : > { %v1600_v12 = vmax.f32 %v1598_v11, %v1599_v55 }
 0x250   : > { %v1760_v62 = vrot.slane %v1759_v41, 1 }
 0x251   : > { %v1632_v14 = vadd.f32 %v3501_v63, %v1600_v12 }
 0x252   : > { %v1761_v18 = vadd.f32 %v1760_v62, %v1759_v41 }
 0x253   : > { %v1656_v9 = vmax.f32 %v1632_v14, 0.0 }
 0x254   : > { %v1777_v43 = vrot.slane %v1761_v18, 7 }
 0x255   : > { %v1718_v27 = vrot.slane %v1656_v9, 5 }
 0x256   : > { %v1783_v56 = vsel %vm1779_vm6, %v1754_v58, %v1777_v43 }
 0x257   : > { %v1719_v59 = vsel %vm1688_vm10, %v1718_v27, %v1717_v29 }
 0x258   : > { %v1762_v45 = vsel %vm1726_vm14, %v1719_v59, 0.0 }
 0x259   : > { %v1763_v63 = vrot.slane %v1762_v45, 4 }
 0x25b   : > { %v1764_v35 = vadd.f32 %v1763_v63, %v1762_v45 }
 0x25d   : > { %v1765_v38 = vrot.slane %v1764_v35, 2 }
 0x25f   : > { %v1766_v42 = vadd.f32 %v1765_v38, %v1764_v35 }
 0x261   : > { %v1767_v32 = vrot.slane %v1766_v42, 1 }
 0x263   : > { %v1768_v44 = vadd.f32 %v1767_v32, %v1766_v42 }
 0x265   : > { %v1778_v48 = vrot.slane %v1768_v44, 6 }
 0x267   : > { %v1784_v33 = vsel %vm1781_vm15, %v1783_v56, %v1778_v48 }
 0x268   : > { %1792 = vst.msk [vmem:[%s3538_s13 + $0x3] sm:$0x7] %vm3532_vm12, %v1784_v33 }
 0x269   : > { %2342 = shalt.err (!%p2339_p3)
}
 0x26a   : > { %s2381_s10 = smov 48   ;;  %s2382_s11 = smov 3  }
 0x26b   : > { %2269 = dma.vmem_to_hbm [thread:$0]  (%p2446_p5), %s1807_s27, 96, %s1809_s28, %s1794_s19, %s2381_s10, %s2381_s10, %s2382_s11  }
 0x26c PF: > { %p2275_p4 = scmp.ge.s32.totalorder %s2377_s18, 2  ;;  %s1823_s12 = sand.u32 1, %s2365_s15  }
 0x26d   : > { %s1824_s13 = scalar_lea.sflag [#allocation3], %s1823_s12 }
 0x26e   : > { %p2272_p7 = pnand %p2275_p4, %p2450_p6 }
 0x270   : > { %p2273_p8 = pneg %p2272_p7 }
 0x272   : > { %2360 = dma.done.wait (%p2273_p8), %s1824_s13, 96  }
 0x273   : > { %2362 = vsyncadd (%p2273_p8), %s1824_s13, 4294967200  ;;  %p14_p9 = scmp.ge.s32.totalorder %s2433_s21, 4   ;;  %s3757_s15 = smov %s2369_s16 }
 0x274   : > { %s3758_s16 = smov %s2373_s17  ;;  %s3759_s17 = smov %s2444_s24 }
 0x275   : > { %s3760_s18 = smov %s2433_s21  ;;  %16 = sbr.rel (!%p14_p9) target bundleno = 3 (0x3), region = 71 }
 0x27a   :  { %1830 = vsyncpa [#allocation3], 1 }
 0x27b   :  { %1832 = vsyncpa [#allocation3 + $0x1], 1 }

</bundles_post_ra>
